<compile_context>
chip_gen: v6e
topology: v6e:2x2x1
jax: 0.10.0
libtpu: 0.0.40
codegen_flags: <defaults>
</compile_context>

<pallas_src>
import math
from functools import partial

import jax
import jax.numpy as jnp
import numpy as np
from jax.experimental import pallas as pl
from jax.experimental.pallas import tpu as pltpu


def _layernorm(x, gamma, beta, eps=1e-5):
    mean = jnp.mean(x, axis=-1, keepdims=True)
    var = jnp.mean((x - mean) ** 2, axis=-1, keepdims=True)
    return (x - mean) * jax.lax.rsqrt(var + eps) * gamma + beta


def encoder_layer_kernel(xq_ref, xkv_ref,
                         wq_ref, bq_ref, wkv_ref, bkv_ref, wo_ref, bo_ref,
                         g1_ref, be1_ref, w1_ref, bf1_ref, w2_ref, bf2_ref,
                         g2_ref, be2_ref,
                         o_ref,
                         q_sc, k_cache, v_cache, m_sc, l_sc, acc_sc,
                         *, heads, compute_dtype):
    qi = pl.program_id(1)
    ki = pl.program_id(2)
    nk = pl.num_programs(2)

    E = xq_ref.shape[-1]
    dh = E // heads

    def to_heads(a2d):
        # (rows, E) -> (heads, rows, dh).  Head h owns columns h*dh:(h+1)*dh, so
        # a single reshape + major-dim swap replaces the old per-head lane
        # slices + stack (one relayout instead of `heads` strided copies).
        rows = a2d.shape[0]
        return jnp.swapaxes(a2d.reshape(rows, heads, dh), 0, 1)

    # ---- once per query tile (ki == 0): reset online softmax, project Q ------
    @pl.when(ki == 0)
    def _():
        m_sc[...] = jnp.full(m_sc.shape, -jnp.inf, m_sc.dtype)
        l_sc[...] = jnp.zeros(l_sc.shape, l_sc.dtype)
        acc_sc[...] = jnp.zeros(acc_sc.shape, acc_sc.dtype)
        xq_c = xq_ref[0].astype(compute_dtype)
        # 1/sqrt(dh) is folded into wq/bq host-side -> q arrives pre-scaled.
        q = jnp.dot(xq_c, wq_ref[...],
                    preferred_element_type=jnp.float32) + bq_ref[...]
        q_sc[...] = to_heads(q).astype(compute_dtype)   # stored once in MXU dtype

    # ---- fill the per-batch K/V cache during the qi == 0 sweep only ----------
    # K/V depend only on (n, ki): the projection matmul and the xkv HBM read are
    # done once per batch; for qi > 0 the tiles are read back from VMEM.
    @pl.when(qi == 0)
    def _():
        xkv_c = xkv_ref[0].astype(compute_dtype)
        kv = jnp.dot(xkv_c, wkv_ref[...],
                     preferred_element_type=jnp.float32) + bkv_ref[...]
        k_cache[ki] = to_heads(kv[:, :E]).astype(compute_dtype)
        v_cache[ki] = to_heads(kv[:, E:]).astype(compute_dtype)

    kh = k_cache[ki]            # (heads, TK, dh) compute dtype
    vh = v_cache[ki]            # (heads, TK, dh) compute dtype
    qh = q_sc[...]              # (heads, TQ, dh) compute dtype (no per-step cast)

    # ---- online-softmax attention update, all heads in one batched dot -------
    s = jnp.einsum('hqd,hkd->hqk', qh, kh,
                   preferred_element_type=jnp.float32)   # (heads, TQ, TK) f32
    m_prev = m_sc[...]
    m_new = jnp.maximum(m_prev, jnp.max(s, axis=-1, keepdims=True))
    # TODO(synk): if a bundle dump shows the EUP exp slot binding on v6e/v7x,
    # fold log2(e) into the host-side wq/bq scale and switch these to exp2.
    alpha = jnp.exp(m_prev - m_new)
    p = jnp.exp(s - m_new)
    l_sc[...] = alpha * l_sc[...] + jnp.sum(p, axis=-1, keepdims=True)
    acc_sc[...] = alpha * acc_sc[...] + jnp.einsum(
        'hqk,hkd->hqd', p.astype(compute_dtype), vh,
        preferred_element_type=jnp.float32)
    m_sc[...] = m_new

    # ---- last KV tile: finish attention, out-proj, LN1, FFN, LN2 -------------
    @pl.when(ki == nk - 1)
    def _():
        # Exact reciprocal (runs once per q-tile): strict softmax parity.
        ctx_h = acc_sc[...] * pl.reciprocal(l_sc[...], approx=False)
        tq = ctx_h.shape[1]
        ctx = jnp.swapaxes(ctx_h, 0, 1).reshape(tq, E)   # (TQ, E) head merge
        attn = jnp.dot(ctx.astype(compute_dtype), wo_ref[...],
                       preferred_element_type=jnp.float32) + bo_ref[...]
        x_res = xq_ref[0].astype(jnp.float32)
        n1 = _layernorm(attn + x_res, g1_ref[...], be1_ref[...])
        h1 = jnp.dot(n1.astype(compute_dtype), w1_ref[...],
                     preferred_element_type=jnp.float32) + bf1_ref[...]
        h1 = jnp.maximum(h1, 0.0)                        # ReLU; Dropout(0.0) = id
        # TODO(synk): for very large d_ff (>= ~8K) on v7x, tile the FFN over
        # d_ff chunks (stream w1 column / w2 row blocks) instead of keeping
        # w1/w2 fully resident.
        ff = jnp.dot(h1.astype(compute_dtype), w2_ref[...],
                     preferred_element_type=jnp.float32) + bf2_ref[...]
        o_ref[0] = _layernorm(ff + n1, g2_ref[...], be2_ref[...]).astype(o_ref.dtype)


def prepare_params(params, heads, compute_dtype):
    """Host-side packing: fold 1/sqrt(dh) into (wq, bq), fuse K|V projections
    into one (E, 2E) weight, cast matmul weights to the MXU compute dtype.
    Biases and LayerNorm parameters stay f32 (elementwise math is f32)."""
    E = params['wq'].shape[0]
    dh = E // heads
    scale = 1.0 / math.sqrt(dh)
    f32 = jnp.float32
    # TODO(synk): on v7x, fp8 MXU operands for w1/w2 would halve FFN weight VMEM
    # and double FFN MXU throughput if the accuracy budget allows.
    return dict(
        wq=(params['wq'] * scale).astype(compute_dtype),
        bq=(params['bq'] * scale).astype(f32),
        wkv=jnp.concatenate([params['wk'], params['wv']], axis=1).astype(compute_dtype),
        bkv=jnp.concatenate([params['bk'], params['bv']], axis=1).astype(f32),
        wo=params['wo'].astype(compute_dtype), bo=params['bo'].astype(f32),
        g1=params['g1'].astype(f32), be1=params['be1'].astype(f32),
        w1=params['w1'].astype(compute_dtype), bf1=params['bf1'].astype(f32),
        w2=params['w2'].astype(compute_dtype), bf2=params['bf2'].astype(f32),
        g2=params['g2'].astype(f32), be2=params['be2'].astype(f32),
    )


def _tpu_generation_defaults(T):
    """Per-generation (default tile, vmem limit): 256 tiles for the 256-wide MXU
    on v6e/v7x, 128 on v5e and older; VMEM limit = capacity - 8 MiB headroom,
    capped at 100 MiB (conservative 56 MiB fallback if the query fails)."""
    tile_base = 256
    vmem_cap = 64 * 1024 * 1024
    try:
        kind = jax.devices()[0].device_kind.lower()
        if any(v in kind for v in ("v2", "v3", "v4", "v5")):
            tile_base = 128      # 128-wide MXU: bigger tiles only add VMEM pressure
    except Exception:
        pass
    try:
        vmem_cap = int(pltpu.get_tpu_info().vmem_capacity_bytes)
    except Exception:
        pass
    vmem_limit = int(min(vmem_cap - 8 * 1024 * 1024, 100 * 1024 * 1024))
    return min(T, tile_base), vmem_limit


def encoder_layer(x, params, heads, *, tq=None, tk=None,
                  compute_dtype=jnp.bfloat16, out_dtype=None):
    N, T, E = x.shape
    assert E % heads == 0
    dh = E // heads
    d_ff = params['w1'].shape[1]
    # bf16 out_dtype halves output writeback bandwidth if the consumer accepts it.
    out_dtype = x.dtype if out_dtype is None else out_dtype

    tile_default, vmem_limit = _tpu_generation_defaults(T)
    tq = tile_default if tq is None else tq
    tk = tile_default if tk is None else tk
    # TODO(synk): no masking/padding path for ragged T; pad host-side if needed.
    assert T % tq == 0 and T % tk == 0
    nk = T // tk

    pp = prepare_params(params, heads, compute_dtype)
    names = ['wq', 'bq', 'wkv', 'bkv', 'wo', 'bo', 'g1', 'be1',
             'w1', 'bf1', 'w2', 'bf2', 'g2', 'be2']
    weights = [pp[n] for n in names]

    # Weights: whole-array, single-buffered VMEM residents (no block pipeline,
    # no double-buffering -> half the resident-weight VMEM of a blocked spec).
    w_spec = pl.BlockSpec(memory_space=pltpu.MemorySpace.VMEM)

    in_specs = (
        [pl.BlockSpec((1, tq, E), lambda n, qi, ki: (n, qi, 0)),     # query rows
         # K/V rows: index only advances during the qi == 0 cache-fill sweep;
         # for qi > 0 it is pinned so the x tile is not re-fetched from HBM.
         pl.BlockSpec((1, tk, E),
                      lambda n, qi, ki: (n, jnp.where(qi == 0, ki, 0), 0))]
        + [w_spec] * len(weights))

    grid = (N, T // tq, nk)

    flops = int(N * T * (8 * E * E + 4 * E * d_ff) + 4 * N * T * T * E)
    transcendentals = int(N * heads * T * T + 4 * N * T)
    weight_bytes = sum(int(w.size) * w.dtype.itemsize for w in weights)
    bytes_accessed = int(2 * x.size * x.dtype.itemsize
                         + N * T * E * jnp.dtype(out_dtype).itemsize
                         + weight_bytes)

    return pl.pallas_call(
        partial(encoder_layer_kernel, heads=heads, compute_dtype=compute_dtype),
        out_shape=jax.ShapeDtypeStruct((N, T, E), out_dtype),
        grid=grid,
        in_specs=in_specs,
        out_specs=pl.BlockSpec((1, tq, E), lambda n, qi, ki: (n, qi, 0)),
        scratch_shapes=[
            pltpu.VMEM((heads, tq, dh), compute_dtype),      # pre-scaled Q (MXU dtype)
            pltpu.VMEM((nk, heads, tk, dh), compute_dtype),  # K cache, whole sequence
            pltpu.VMEM((nk, heads, tk, dh), compute_dtype),  # V cache, whole sequence
            pltpu.VMEM((heads, tq, 1), jnp.float32),         # running row max
            pltpu.VMEM((heads, tq, 1), jnp.float32),         # running softmax denom
            pltpu.VMEM((heads, tq, dh), jnp.float32),        # weighted-V accumulator
        ],
        # The per-batch K/V cache lives in per-core scratch, so the q-tile axis
        # must stay on one core ("arbitrary"); batch carries megacore parallelism.
        compiler_params=pltpu.CompilerParams(
            dimension_semantics=("parallel", "arbitrary", "arbitrary"),
            vmem_limit_bytes=vmem_limit),
        cost_estimate=pl.CostEstimate(flops=flops,
                                      transcendentals=transcendentals,
                                      bytes_accessed=bytes_accessed),
    )(x, x, *weights)


def init_params(key, embed_size, d_ff):
    def linear(k, fan_in, fan_out):
        bound = 1.0 / math.sqrt(fan_in)
        kw, kb = jax.random.split(k)
        w = jax.random.uniform(kw, (fan_in, fan_out), jnp.float32, -bound, bound)
        b = jax.random.uniform(kb, (1, fan_out), jnp.float32, -bound, bound)
        return w, b

    keys = jax.random.split(key, 6)
    wq, bq = linear(keys[0], embed_size, embed_size)
    wk, bk = linear(keys[1], embed_size, embed_size)
    wv, bv = linear(keys[2], embed_size, embed_size)
    wo, bo = linear(keys[3], embed_size, embed_size)
    w1, bf1 = linear(keys[4], embed_size, d_ff)
    w2, bf2 = linear(keys[5], d_ff, embed_size)
    return dict(
        wq=wq, bq=bq, wk=wk, bk=bk, wv=wv, bv=bv, wo=wo, bo=bo,
        g1=jnp.ones((1, embed_size), jnp.float32),
        be1=jnp.zeros((1, embed_size), jnp.float32),
        w1=w1, bf1=bf1, w2=w2, bf2=bf2,
        g2=jnp.ones((1, embed_size), jnp.float32),
        be2=jnp.zeros((1, embed_size), jnp.float32),
    )


def encoder_layer_ref(x, p, heads):
    """Independent pure-JAX f32 reference (standard MHA + FFN + LayerNorms)."""
    N, T, E = x.shape
    dh = E // heads
    scale = 1.0 / math.sqrt(dh)

    def per_batch(xb):
        q = xb @ p['wq'] + p['bq']
        k = xb @ p['wk'] + p['bk']
        v = xb @ p['wv'] + p['bv']
        outs = []
        for h in range(heads):
            qh, kh, vh = (a[:, h * dh:(h + 1) * dh] for a in (q, k, v))
            s = (qh @ kh.T) * scale
            pw = jax.nn.softmax(s, axis=-1)
            outs.append(pw @ vh)
        ctx = jnp.concatenate(outs, axis=-1)
        attn = ctx @ p['wo'] + p['bo']
        n1 = _layernorm(attn + xb, p['g1'], p['be1'])
        ff = jnp.maximum(n1 @ p['w1'] + p['bf1'], 0.0) @ p['w2'] + p['bf2']
        return _layernorm(ff + n1, p['g2'], p['be2'])

    return jax.vmap(per_batch)(x)


if __name__ == "__main__":
    N, T, E = 2, 16, 32
    heads, d_ff = 4, 64
    tq = tk = 8          # grid (N, 2, 2): exercises the KV loop AND the qi>0
                         # path that reads the cached K/V projections from VMEM.

    key = jax.random.PRNGKey(0)
    kx, kp = jax.random.split(key)
    x = jax.random.normal(kx, (N, T, E), jnp.float32)
    params = init_params(kp, E, d_ff)

    ref = jax.block_until_ready(encoder_layer_ref(x, params, heads))

    # 1) f32 compute path: check against the independent reference.
    out_f32 = jax.block_until_ready(
        encoder_layer(x, params, heads, tq=tq, tk=tk, compute_dtype=jnp.float32))
    np.testing.assert_allclose(np.asarray(out_f32), np.asarray(ref),
                               rtol=2e-2, atol=2e-2)

    # 2) bf16 MXU-operand path (f32 accumulation, f32 softmax/LayerNorm stats):
    #    loose check — deviation from the f32 reference is bf16 rounding only.
    out_bf16 = jax.block_until_ready(
        encoder_layer(x, params, heads, tq=tq, tk=tk, compute_dtype=jnp.bfloat16))
    assert bool(jnp.all(jnp.isfinite(out_bf16)))
    np.testing.assert_allclose(np.asarray(out_bf16), np.asarray(ref),
                               rtol=5e-2, atol=2e-1)

    print("KERNEL_OK")
</pallas_src>

<mosaic_0001>
module attributes {stable_mosaic.version = 11 : i64} {
  func.func @encoder_layer_kernel(%arg0: i32, %arg1: i32, %arg2: i32, %arg3: memref<1x8x32xf32, #tpu.memory_space<vmem>>, %arg4: memref<1x8x32xf32, #tpu.memory_space<vmem>>, %arg5: memref<32x32xf32, #tpu.memory_space<vmem>>, %arg6: memref<1x32xf32, #tpu.memory_space<vmem>>, %arg7: memref<32x64xf32, #tpu.memory_space<vmem>>, %arg8: memref<1x64xf32, #tpu.memory_space<vmem>>, %arg9: memref<32x32xf32, #tpu.memory_space<vmem>>, %arg10: memref<1x32xf32, #tpu.memory_space<vmem>>, %arg11: memref<1x32xf32, #tpu.memory_space<vmem>>, %arg12: memref<1x32xf32, #tpu.memory_space<vmem>>, %arg13: memref<32x64xf32, #tpu.memory_space<vmem>>, %arg14: memref<1x64xf32, #tpu.memory_space<vmem>>, %arg15: memref<64x32xf32, #tpu.memory_space<vmem>>, %arg16: memref<1x32xf32, #tpu.memory_space<vmem>>, %arg17: memref<1x32xf32, #tpu.memory_space<vmem>>, %arg18: memref<1x32xf32, #tpu.memory_space<vmem>>, %arg19: memref<1x8x32xf32, #tpu.memory_space<vmem>>, %arg20: memref<4x8x8xf32, #tpu.memory_space<vmem>>, %arg21: memref<2x4x8x8xf32, #tpu.memory_space<vmem>>, %arg22: memref<2x4x8x8xf32, #tpu.memory_space<vmem>>, %arg23: memref<4x8x1xf32, #tpu.memory_space<vmem>>, %arg24: memref<4x8x1xf32, #tpu.memory_space<vmem>>, %arg25: memref<4x8x8xf32, #tpu.memory_space<vmem>>) attributes {dimension_semantics = [#tpu.dimension_semantics<parallel>, #tpu.dimension_semantics<arbitrary>, #tpu.dimension_semantics<arbitrary>], iteration_bounds = array<i64: 2, 2, 2>, scalar_prefetch = 0 : i64, scratch_operands = 6 : i64, tpu.core_type = #tpu.core_type<tc>, window_params = [{transform_indices = @transform_0, window_bounds = array<i64: 1, 8, 32>}, {transform_indices = @transform_1, window_bounds = array<i64: 1, 8, 32>}, {pipeline_mode = #tpu.pipeline_mode<synchronous>, transform_indices = @transform_2, window_bounds = array<i64: 32, 32>}, {pipeline_mode = #tpu.pipeline_mode<synchronous>, transform_indices = @transform_3, window_bounds = array<i64: 1, 32>}, {pipeline_mode = #tpu.pipeline_mode<synchronous>, transform_indices = @transform_4, window_bounds = array<i64: 32, 64>}, {pipeline_mode = #tpu.pipeline_mode<synchronous>, transform_indices = @transform_5, window_bounds = array<i64: 1, 64>}, {pipeline_mode = #tpu.pipeline_mode<synchronous>, transform_indices = @transform_6, window_bounds = array<i64: 32, 32>}, {pipeline_mode = #tpu.pipeline_mode<synchronous>, transform_indices = @transform_7, window_bounds = array<i64: 1, 32>}, {pipeline_mode = #tpu.pipeline_mode<synchronous>, transform_indices = @transform_8, window_bounds = array<i64: 1, 32>}, {pipeline_mode = #tpu.pipeline_mode<synchronous>, transform_indices = @transform_9, window_bounds = array<i64: 1, 32>}, {pipeline_mode = #tpu.pipeline_mode<synchronous>, transform_indices = @transform_10, window_bounds = array<i64: 32, 64>}, {pipeline_mode = #tpu.pipeline_mode<synchronous>, transform_indices = @transform_11, window_bounds = array<i64: 1, 64>}, {pipeline_mode = #tpu.pipeline_mode<synchronous>, transform_indices = @transform_12, window_bounds = array<i64: 64, 32>}, {pipeline_mode = #tpu.pipeline_mode<synchronous>, transform_indices = @transform_13, window_bounds = array<i64: 1, 32>}, {pipeline_mode = #tpu.pipeline_mode<synchronous>, transform_indices = @transform_14, window_bounds = array<i64: 1, 32>}, {pipeline_mode = #tpu.pipeline_mode<synchronous>, transform_indices = @transform_15, window_bounds = array<i64: 1, 32>}, {transform_indices = @transform_16, window_bounds = array<i64: 1, 8, 32>}]} {
    %c0_i32 = arith.constant 0 : i32
    %0 = arith.cmpi eq, %arg2, %c0_i32 : i32
    %1 = arith.extui %0 : i1 to i32
    %c0_i32_0 = arith.constant 0 : i32
    %2 = arith.cmpi ne, %1, %c0_i32_0 : i32
    scf.if %2 {
      %cst_33 = arith.constant 0xFF800000 : f32
      %39 = vector.broadcast %cst_33 : f32 to vector<4x8x1xf32>
      %c0_34 = arith.constant 0 : index
      %c0_35 = arith.constant 0 : index
      %c0_36 = arith.constant 0 : index
      %40 = vector.load %arg23[%c0_34, %c0_35, %c0_36] : memref<4x8x1xf32, #tpu.memory_space<vmem>>, vector<4x8x1xf32>
      tpu.vector_store %arg23[%c0_34, %c0_35, %c0_36], %39 {strides = array<i32>} : memref<4x8x1xf32, #tpu.memory_space<vmem>>, vector<4x8x1xf32>,
      %cst_37 = arith.constant 0.000000e+00 : f32
      %41 = vector.broadcast %cst_37 : f32 to vector<4x8x1xf32>
      %c0_38 = arith.constant 0 : index
      %c0_39 = arith.constant 0 : index
      %c0_40 = arith.constant 0 : index
      %42 = vector.load %arg24[%c0_38, %c0_39, %c0_40] : memref<4x8x1xf32, #tpu.memory_space<vmem>>, vector<4x8x1xf32>
      tpu.vector_store %arg24[%c0_38, %c0_39, %c0_40], %41 {strides = array<i32>} : memref<4x8x1xf32, #tpu.memory_space<vmem>>, vector<4x8x1xf32>,
      %cst_41 = arith.constant 0.000000e+00 : f32
      %43 = vector.broadcast %cst_41 : f32 to vector<4x8x8xf32>
      %c0_42 = arith.constant 0 : index
      %c0_43 = arith.constant 0 : index
      %c0_44 = arith.constant 0 : index
      %44 = vector.load %arg25[%c0_42, %c0_43, %c0_44] : memref<4x8x8xf32, #tpu.memory_space<vmem>>, vector<4x8x8xf32>
      tpu.vector_store %arg25[%c0_42, %c0_43, %c0_44], %43 {strides = array<i32>} : memref<4x8x8xf32, #tpu.memory_space<vmem>>, vector<4x8x8xf32>,
      %c0_45 = arith.constant 0 : index
      %c0_46 = arith.constant 0 : index
      %c0_47 = arith.constant 0 : index
      %45 = vector.load %arg3[%c0_45, %c0_46, %c0_47] : memref<1x8x32xf32, #tpu.memory_space<vmem>>, vector<1x8x32xf32>
      %46 = vector.shape_cast %45 : vector<1x8x32xf32> to vector<8x32xf32>
      %c0_48 = arith.constant 0 : index
      %c0_49 = arith.constant 0 : index
      %47 = vector.load %arg5[%c0_48, %c0_49] : memref<32x32xf32, #tpu.memory_space<vmem>>, vector<32x32xf32>
      %cst_50 = arith.constant dense<0.000000e+00> : vector<8x32xf32>
      %48 = tpu.matmul %46, %47, %cst_50 {dimension_numbers = #tpu.dot_dimension_numbers<[1], [0], [0], [1], [0, 0, 1, 1], [], []>} : vector<8x32xf32>, vector<32x32xf32>, vector<8x32xf32> -> vector<8x32xf32>
      %c0_51 = arith.constant 0 : index
      %c0_52 = arith.constant 0 : index
      %49 = vector.load %arg6[%c0_51, %c0_52] : memref<1x32xf32, #tpu.memory_space<vmem>>, vector<1x32xf32>
      %50 = vector.broadcast %49 : vector<1x32xf32> to vector<8x32xf32>
      %51 = arith.addf %48, %50 : vector<8x32xf32>
      %52 = vector.shape_cast %51 : vector<8x32xf32> to vector<8x4x8xf32>
      %53 = tpu.transpose %52, [1, 0, 2] : vector<8x4x8xf32> -> vector<4x8x8xf32>
      %c0_53 = arith.constant 0 : index
      %c0_54 = arith.constant 0 : index
      %c0_55 = arith.constant 0 : index
      %54 = vector.load %arg20[%c0_53, %c0_54, %c0_55] : memref<4x8x8xf32, #tpu.memory_space<vmem>>, vector<4x8x8xf32>
      tpu.vector_store %arg20[%c0_53, %c0_54, %c0_55], %53 {strides = array<i32>} : memref<4x8x8xf32, #tpu.memory_space<vmem>>, vector<4x8x8xf32>,
    } else {
    }
    %c0_i32_1 = arith.constant 0 : i32
    %3 = arith.cmpi eq, %arg1, %c0_i32_1 : i32
    %4 = arith.extui %3 : i1 to i32
    %c0_i32_2 = arith.constant 0 : i32
    %5 = arith.cmpi ne, %4, %c0_i32_2 : i32
    scf.if %5 {
      %c0_33 = arith.constant 0 : index
      %c0_34 = arith.constant 0 : index
      %c0_35 = arith.constant 0 : index
      %39 = vector.load %arg4[%c0_33, %c0_34, %c0_35] : memref<1x8x32xf32, #tpu.memory_space<vmem>>, vector<1x8x32xf32>
      %40 = vector.shape_cast %39 : vector<1x8x32xf32> to vector<8x32xf32>
      %c0_36 = arith.constant 0 : index
      %c0_37 = arith.constant 0 : index
      %41 = vector.load %arg7[%c0_36, %c0_37] : memref<32x64xf32, #tpu.memory_space<vmem>>, vector<32x64xf32>
      %cst_38 = arith.constant dense<0.000000e+00> : vector<8x64xf32>
      %42 = tpu.matmul %40, %41, %cst_38 {dimension_numbers = #tpu.dot_dimension_numbers<[1], [0], [0], [1], [0, 0, 1, 1], [], []>} : vector<8x32xf32>, vector<32x64xf32>, vector<8x64xf32> -> vector<8x64xf32>
      %c0_39 = arith.constant 0 : index
      %c0_40 = arith.constant 0 : index
      %43 = vector.load %arg8[%c0_39, %c0_40] : memref<1x64xf32, #tpu.memory_space<vmem>>, vector<1x64xf32>
      %44 = vector.broadcast %43 : vector<1x64xf32> to vector<8x64xf32>
      %45 = arith.addf %42, %44 : vector<8x64xf32>
      %46 = vector.extract_strided_slice %45 {offsets = [0, 0], sizes = [8, 32], strides = [1, 1]} : vector<8x64xf32> to vector<8x32xf32>
      %47 = vector.shape_cast %46 : vector<8x32xf32> to vector<8x4x8xf32>
      %48 = tpu.transpose %47, [1, 0, 2] : vector<8x4x8xf32> -> vector<4x8x8xf32>
      %49 = arith.index_cast %arg2 : i32 to index
      %c0_41 = arith.constant 0 : index
      %c0_42 = arith.constant 0 : index
      %c0_43 = arith.constant 0 : index
      %50 = vector.load %arg21[%49, %c0_41, %c0_42, %c0_43] : memref<2x4x8x8xf32, #tpu.memory_space<vmem>>, vector<1x4x8x8xf32>
      %51 = vector.shape_cast %50 : vector<1x4x8x8xf32> to vector<4x8x8xf32>
      %52 = vector.shape_cast %48 : vector<4x8x8xf32> to vector<1x4x8x8xf32>
      tpu.vector_store %arg21[%49, %c0_41, %c0_42, %c0_43], %52 {strides = array<i32>} : memref<2x4x8x8xf32, #tpu.memory_space<vmem>>, vector<1x4x8x8xf32>,
      %53 = vector.extract_strided_slice %45 {offsets = [0, 32], sizes = [8, 32], strides = [1, 1]} : vector<8x64xf32> to vector<8x32xf32>
      %54 = vector.shape_cast %53 : vector<8x32xf32> to vector<8x4x8xf32>
      %55 = tpu.transpose %54, [1, 0, 2] : vector<8x4x8xf32> -> vector<4x8x8xf32>
      %56 = arith.index_cast %arg2 : i32 to index
      %c0_44 = arith.constant 0 : index
      %c0_45 = arith.constant 0 : index
      %c0_46 = arith.constant 0 : index
      %57 = vector.load %arg22[%56, %c0_44, %c0_45, %c0_46] : memref<2x4x8x8xf32, #tpu.memory_space<vmem>>, vector<1x4x8x8xf32>
      %58 = vector.shape_cast %57 : vector<1x4x8x8xf32> to vector<4x8x8xf32>
      %59 = vector.shape_cast %55 : vector<4x8x8xf32> to vector<1x4x8x8xf32>
      tpu.vector_store %arg22[%56, %c0_44, %c0_45, %c0_46], %59 {strides = array<i32>} : memref<2x4x8x8xf32, #tpu.memory_space<vmem>>, vector<1x4x8x8xf32>,
    } else {
    }
    %6 = arith.index_cast %arg2 : i32 to index
    %c0 = arith.constant 0 : index
    %c0_3 = arith.constant 0 : index
    %c0_4 = arith.constant 0 : index
    %7 = vector.load %arg21[%6, %c0, %c0_3, %c0_4] : memref<2x4x8x8xf32, #tpu.memory_space<vmem>>, vector<1x4x8x8xf32>
    %8 = vector.shape_cast %7 : vector<1x4x8x8xf32> to vector<4x8x8xf32>
    %9 = arith.index_cast %arg2 : i32 to index
    %c0_5 = arith.constant 0 : index
    %c0_6 = arith.constant 0 : index
    %c0_7 = arith.constant 0 : index
    %10 = vector.load %arg22[%9, %c0_5, %c0_6, %c0_7] : memref<2x4x8x8xf32, #tpu.memory_space<vmem>>, vector<1x4x8x8xf32>
    %11 = vector.shape_cast %10 : vector<1x4x8x8xf32> to vector<4x8x8xf32>
    %c0_8 = arith.constant 0 : index
    %c0_9 = arith.constant 0 : index
    %c0_10 = arith.constant 0 : index
    %12 = vector.load %arg20[%c0_8, %c0_9, %c0_10] : memref<4x8x8xf32, #tpu.memory_space<vmem>>, vector<4x8x8xf32>
    "tpu.trace_start"() <{level = 10 : i32, message = "hqd,hkd->hqk"}> : () -> ()
    %cst = arith.constant dense<0.000000e+00> : vector<4x8x8xf32>
    %13 = tpu.matmul %12, %8, %cst {dimension_numbers = #tpu.dot_dimension_numbers<[2], [2], [1], [1], [0, 0, 0, 1, 1, 1], [0], [0]>} : vector<4x8x8xf32>, vector<4x8x8xf32>, vector<4x8x8xf32> -> vector<4x8x8xf32>
    "tpu.trace_stop"() : () -> ()
    %c0_11 = arith.constant 0 : index
    %c0_12 = arith.constant 0 : index
    %c0_13 = arith.constant 0 : index
    %14 = vector.load %arg23[%c0_11, %c0_12, %c0_13] : memref<4x8x1xf32, #tpu.memory_space<vmem>>, vector<4x8x1xf32>
    %cst_14 = arith.constant dense<0xFF800000> : vector<4x8xf32>
    %15 = vector.multi_reduction <maximumf>, %13, %cst_14 [2] : vector<4x8x8xf32> to vector<4x8xf32>
    %16 = vector.shape_cast %15 : vector<4x8xf32> to vector<4x8x1xf32>
    %17 = arith.maximumf %14, %16 : vector<4x8x1xf32>
    %18 = arith.subf %14, %17 : vector<4x8x1xf32>
    %19 = math.exp %18 : vector<4x8x1xf32>
    %20 = vector.broadcast %17 : vector<4x8x1xf32> to vector<4x8x8xf32>
    %21 = arith.subf %13, %20 : vector<4x8x8xf32>
    %22 = math.exp %21 : vector<4x8x8xf32>
    %c0_15 = arith.constant 0 : index
    %c0_16 = arith.constant 0 : index
    %c0_17 = arith.constant 0 : index
    %23 = vector.load %arg24[%c0_15, %c0_16, %c0_17] : memref<4x8x1xf32, #tpu.memory_space<vmem>>, vector<4x8x1xf32>
    %24 = arith.mulf %19, %23 : vector<4x8x1xf32>
    %cst_18 = arith.constant dense<0.000000e+00> : vector<4x8xf32>
    %25 = vector.multi_reduction <add>, %22, %cst_18 [2] : vector<4x8x8xf32> to vector<4x8xf32>
    %26 = vector.shape_cast %25 : vector<4x8xf32> to vector<4x8x1xf32>
    %27 = arith.addf %24, %26 : vector<4x8x1xf32>
    %c0_19 = arith.constant 0 : index
    %c0_20 = arith.constant 0 : index
    %c0_21 = arith.constant 0 : index
    %28 = vector.load %arg24[%c0_19, %c0_20, %c0_21] : memref<4x8x1xf32, #tpu.memory_space<vmem>>, vector<4x8x1xf32>
    tpu.vector_store %arg24[%c0_19, %c0_20, %c0_21], %27 {strides = array<i32>} : memref<4x8x1xf32, #tpu.memory_space<vmem>>, vector<4x8x1xf32>,
    %c0_22 = arith.constant 0 : index
    %c0_23 = arith.constant 0 : index
    %c0_24 = arith.constant 0 : index
    %29 = vector.load %arg25[%c0_22, %c0_23, %c0_24] : memref<4x8x8xf32, #tpu.memory_space<vmem>>, vector<4x8x8xf32>
    %30 = vector.broadcast %19 : vector<4x8x1xf32> to vector<4x8x8xf32>
    %31 = arith.mulf %30, %29 : vector<4x8x8xf32>
    "tpu.trace_start"() <{level = 10 : i32, message = "hqk,hkd->hqd"}> : () -> ()
    %cst_25 = arith.constant dense<0.000000e+00> : vector<4x8x8xf32>
    %32 = tpu.matmul %22, %11, %cst_25 {dimension_numbers = #tpu.dot_dimension_numbers<[2], [1], [1], [2], [0, 0, 0, 1, 1, 2], [0], [0]>} : vector<4x8x8xf32>, vector<4x8x8xf32>, vector<4x8x8xf32> -> vector<4x8x8xf32>
    "tpu.trace_stop"() : () -> ()
    %33 = arith.addf %31, %32 : vector<4x8x8xf32>
    %c0_26 = arith.constant 0 : index
    %c0_27 = arith.constant 0 : index
    %c0_28 = arith.constant 0 : index
    %34 = vector.load %arg25[%c0_26, %c0_27, %c0_28] : memref<4x8x8xf32, #tpu.memory_space<vmem>>, vector<4x8x8xf32>
    tpu.vector_store %arg25[%c0_26, %c0_27, %c0_28], %33 {strides = array<i32>} : memref<4x8x8xf32, #tpu.memory_space<vmem>>, vector<4x8x8xf32>,
    %c0_29 = arith.constant 0 : index
    %c0_30 = arith.constant 0 : index
    %c0_31 = arith.constant 0 : index
    %35 = vector.load %arg23[%c0_29, %c0_30, %c0_31] : memref<4x8x1xf32, #tpu.memory_space<vmem>>, vector<4x8x1xf32>
    tpu.vector_store %arg23[%c0_29, %c0_30, %c0_31], %17 {strides = array<i32>} : memref<4x8x1xf32, #tpu.memory_space<vmem>>, vector<4x8x1xf32>,
    %c1_i32 = arith.constant 1 : i32
    %36 = arith.cmpi eq, %arg2, %c1_i32 : i32
    %37 = arith.extui %36 : i1 to i32
    %c0_i32_32 = arith.constant 0 : i32
    %38 = arith.cmpi ne, %37, %c0_i32_32 : i32
    scf.if %38 {
      %c0_33 = arith.constant 0 : index
      %c0_34 = arith.constant 0 : index
      %c0_35 = arith.constant 0 : index
      %39 = vector.load %arg25[%c0_33, %c0_34, %c0_35] : memref<4x8x8xf32, #tpu.memory_space<vmem>>, vector<4x8x8xf32>
      %c0_36 = arith.constant 0 : index
      %c0_37 = arith.constant 0 : index
      %c0_38 = arith.constant 0 : index
      %40 = vector.load %arg24[%c0_36, %c0_37, %c0_38] : memref<4x8x1xf32, #tpu.memory_space<vmem>>, vector<4x8x1xf32>
      %41 = tpu.reciprocal %40 : vector<4x8x1xf32> -> vector<4x8x1xf32>
      %42 = vector.broadcast %41 : vector<4x8x1xf32> to vector<4x8x8xf32>
      %43 = arith.mulf %39, %42 : vector<4x8x8xf32>
      %44 = tpu.transpose %43, [1, 0, 2] : vector<4x8x8xf32> -> vector<8x4x8xf32>
      %45 = vector.shape_cast %44 : vector<8x4x8xf32> to vector<8x32xf32>
      %c0_39 = arith.constant 0 : index
      %c0_40 = arith.constant 0 : index
      %46 = vector.load %arg9[%c0_39, %c0_40] : memref<32x32xf32, #tpu.memory_space<vmem>>, vector<32x32xf32>
      %cst_41 = arith.constant dense<0.000000e+00> : vector<8x32xf32>
      %47 = tpu.matmul %45, %46, %cst_41 {dimension_numbers = #tpu.dot_dimension_numbers<[1], [0], [0], [1], [0, 0, 1, 1], [], []>} : vector<8x32xf32>, vector<32x32xf32>, vector<8x32xf32> -> vector<8x32xf32>
      %c0_42 = arith.constant 0 : index
      %c0_43 = arith.constant 0 : index
      %48 = vector.load %arg10[%c0_42, %c0_43] : memref<1x32xf32, #tpu.memory_space<vmem>>, vector<1x32xf32>
      %49 = vector.broadcast %48 : vector<1x32xf32> to vector<8x32xf32>
      %50 = arith.addf %47, %49 : vector<8x32xf32>
      %c0_44 = arith.constant 0 : index
      %c0_45 = arith.constant 0 : index
      %c0_46 = arith.constant 0 : index
      %51 = vector.load %arg3[%c0_44, %c0_45, %c0_46] : memref<1x8x32xf32, #tpu.memory_space<vmem>>, vector<1x8x32xf32>
      %52 = vector.shape_cast %51 : vector<1x8x32xf32> to vector<8x32xf32>
      %53 = arith.addf %50, %52 : vector<8x32xf32>
      %c0_47 = arith.constant 0 : index
      %c0_48 = arith.constant 0 : index
      %54 = vector.load %arg11[%c0_47, %c0_48] : memref<1x32xf32, #tpu.memory_space<vmem>>, vector<1x32xf32>
      %c0_49 = arith.constant 0 : index
      %c0_50 = arith.constant 0 : index
      %55 = vector.load %arg12[%c0_49, %c0_50] : memref<1x32xf32, #tpu.memory_space<vmem>>, vector<1x32xf32>
      %cst_51 = arith.constant dense<0.000000e+00> : vector<8xf32>
      %56 = vector.multi_reduction <add>, %53, %cst_51 [1] : vector<8x32xf32> to vector<8xf32>
      %57 = vector.shape_cast %56 : vector<8xf32> to vector<8x1xf32>
      %cst_52 = arith.constant 3.200000e+01 : f32
      %58 = vector.broadcast %cst_52 : f32 to vector<8x1xf32>
      %59 = arith.divf %57, %58 : vector<8x1xf32>
      %60 = vector.broadcast %59 : vector<8x1xf32> to vector<8x32xf32>
      %61 = arith.subf %53, %60 : vector<8x32xf32>
      %62 = arith.mulf %61, %61 : vector<8x32xf32>
      %cst_53 = arith.constant dense<0.000000e+00> : vector<8xf32>
      %63 = vector.multi_reduction <add>, %62, %cst_53 [1] : vector<8x32xf32> to vector<8xf32>
      %64 = vector.shape_cast %63 : vector<8xf32> to vector<8x1xf32>
      %cst_54 = arith.constant 3.200000e+01 : f32
      %65 = vector.broadcast %cst_54 : f32 to vector<8x1xf32>
      %66 = arith.divf %64, %65 : vector<8x1xf32>
      %67 = vector.broadcast %59 : vector<8x1xf32> to vector<8x32xf32>
      %68 = arith.subf %53, %67 : vector<8x32xf32>
      %cst_55 = arith.constant 9.99999974E-6 : f32
      %69 = vector.broadcast %cst_55 : f32 to vector<8x1xf32>
      %70 = arith.addf %66, %69 : vector<8x1xf32>
      %71 = math.rsqrt %70 : vector<8x1xf32>
      %72 = vector.broadcast %71 : vector<8x1xf32> to vector<8x32xf32>
      %73 = arith.mulf %68, %72 : vector<8x32xf32>
      %74 = vector.broadcast %54 : vector<1x32xf32> to vector<8x32xf32>
      %75 = arith.mulf %73, %74 : vector<8x32xf32>
      %76 = vector.broadcast %55 : vector<1x32xf32> to vector<8x32xf32>
      %77 = arith.addf %75, %76 : vector<8x32xf32>
      %c0_56 = arith.constant 0 : index
      %c0_57 = arith.constant 0 : index
      %78 = vector.load %arg13[%c0_56, %c0_57] : memref<32x64xf32, #tpu.memory_space<vmem>>, vector<32x64xf32>
      %cst_58 = arith.constant dense<0.000000e+00> : vector<8x64xf32>
      %79 = tpu.matmul %77, %78, %cst_58 {dimension_numbers = #tpu.dot_dimension_numbers<[1], [0], [0], [1], [0, 0, 1, 1], [], []>} : vector<8x32xf32>, vector<32x64xf32>, vector<8x64xf32> -> vector<8x64xf32>
      %c0_59 = arith.constant 0 : index
      %c0_60 = arith.constant 0 : index
      %80 = vector.load %arg14[%c0_59, %c0_60] : memref<1x64xf32, #tpu.memory_space<vmem>>, vector<1x64xf32>
      %81 = vector.broadcast %80 : vector<1x64xf32> to vector<8x64xf32>
      %82 = arith.addf %79, %81 : vector<8x64xf32>
      %cst_61 = arith.constant 0.000000e+00 : f32
      %83 = vector.broadcast %cst_61 : f32 to vector<8x64xf32>
      %84 = arith.maximumf %82, %83 : vector<8x64xf32>
      %c0_62 = arith.constant 0 : index
      %c0_63 = arith.constant 0 : index
      %85 = vector.load %arg15[%c0_62, %c0_63] : memref<64x32xf32, #tpu.memory_space<vmem>>, vector<64x32xf32>
      %cst_64 = arith.constant dense<0.000000e+00> : vector<8x32xf32>
      %86 = tpu.matmul %84, %85, %cst_64 {dimension_numbers = #tpu.dot_dimension_numbers<[1], [0], [0], [1], [0, 0, 1, 1], [], []>} : vector<8x64xf32>, vector<64x32xf32>, vector<8x32xf32> -> vector<8x32xf32>
      %c0_65 = arith.constant 0 : index
      %c0_66 = arith.constant 0 : index
      %87 = vector.load %arg16[%c0_65, %c0_66] : memref<1x32xf32, #tpu.memory_space<vmem>>, vector<1x32xf32>
      %88 = vector.broadcast %87 : vector<1x32xf32> to vector<8x32xf32>
      %89 = arith.addf %86, %88 : vector<8x32xf32>
      %90 = arith.addf %89, %77 : vector<8x32xf32>
      %c0_67 = arith.constant 0 : index
      %c0_68 = arith.constant 0 : index
      %91 = vector.load %arg17[%c0_67, %c0_68] : memref<1x32xf32, #tpu.memory_space<vmem>>, vector<1x32xf32>
      %c0_69 = arith.constant 0 : index
      %c0_70 = arith.constant 0 : index
      %92 = vector.load %arg18[%c0_69, %c0_70] : memref<1x32xf32, #tpu.memory_space<vmem>>, vector<1x32xf32>
      %cst_71 = arith.constant dense<0.000000e+00> : vector<8xf32>
      %93 = vector.multi_reduction <add>, %90, %cst_71 [1] : vector<8x32xf32> to vector<8xf32>
      %94 = vector.shape_cast %93 : vector<8xf32> to vector<8x1xf32>
      %cst_72 = arith.constant 3.200000e+01 : f32
      %95 = vector.broadcast %cst_72 : f32 to vector<8x1xf32>
      %96 = arith.divf %94, %95 : vector<8x1xf32>
      %97 = vector.broadcast %96 : vector<8x1xf32> to vector<8x32xf32>
      %98 = arith.subf %90, %97 : vector<8x32xf32>
      %99 = arith.mulf %98, %98 : vector<8x32xf32>
      %cst_73 = arith.constant dense<0.000000e+00> : vector<8xf32>
      %100 = vector.multi_reduction <add>, %99, %cst_73 [1] : vector<8x32xf32> to vector<8xf32>
      %101 = vector.shape_cast %100 : vector<8xf32> to vector<8x1xf32>
      %cst_74 = arith.constant 3.200000e+01 : f32
      %102 = vector.broadcast %cst_74 : f32 to vector<8x1xf32>
      %103 = arith.divf %101, %102 : vector<8x1xf32>
      %104 = vector.broadcast %96 : vector<8x1xf32> to vector<8x32xf32>
      %105 = arith.subf %90, %104 : vector<8x32xf32>
      %cst_75 = arith.constant 9.99999974E-6 : f32
      %106 = vector.broadcast %cst_75 : f32 to vector<8x1xf32>
      %107 = arith.addf %103, %106 : vector<8x1xf32>
      %108 = math.rsqrt %107 : vector<8x1xf32>
      %109 = vector.broadcast %108 : vector<8x1xf32> to vector<8x32xf32>
      %110 = arith.mulf %105, %109 : vector<8x32xf32>
      %111 = vector.broadcast %91 : vector<1x32xf32> to vector<8x32xf32>
      %112 = arith.mulf %110, %111 : vector<8x32xf32>
      %113 = vector.broadcast %92 : vector<1x32xf32> to vector<8x32xf32>
      %114 = arith.addf %112, %113 : vector<8x32xf32>
      %c0_76 = arith.constant 0 : index
      %c0_77 = arith.constant 0 : index
      %c0_78 = arith.constant 0 : index
      %115 = vector.load %arg19[%c0_76, %c0_77, %c0_78] : memref<1x8x32xf32, #tpu.memory_space<vmem>>, vector<1x8x32xf32>
      %116 = vector.shape_cast %115 : vector<1x8x32xf32> to vector<8x32xf32>
      %117 = vector.shape_cast %114 : vector<8x32xf32> to vector<1x8x32xf32>
      tpu.vector_store %arg19[%c0_76, %c0_77, %c0_78], %117 {strides = array<i32>} : memref<1x8x32xf32, #tpu.memory_space<vmem>>, vector<1x8x32xf32>,
    } else {
    }
    return
  }
  func.func @transform_0(%arg0: i32, %arg1: i32, %arg2: i32) -> (i32, i32, i32) {
    %c0_i32 = arith.constant 0 : i32
    %c0_i32_0 = arith.constant 0 : i32
    return %arg0, %arg1, %c0_i32 : i32, i32, i32
  }
  func.func @transform_1(%arg0: i32, %arg1: i32, %arg2: i32) -> (i32, i32, i32) {
    %c0_i32 = arith.constant 0 : i32
    %0 = arith.cmpi eq, %arg1, %c0_i32 : i32
    %c0_i32_0 = arith.constant 0 : i32
    %1 = arith.select %0, %arg2, %c0_i32_0 : i32
    %c0_i32_1 = arith.constant 0 : i32
    %c0_i32_2 = arith.constant 0 : i32
    return %arg0, %1, %c0_i32_1 : i32, i32, i32
  }
  func.func @transform_2(%arg0: i32, %arg1: i32, %arg2: i32) -> (i32, i32) {
    %c0_i32 = arith.constant 0 : i32
    %c0_i32_0 = arith.constant 0 : i32
    %c0_i32_1 = arith.constant 0 : i32
    return %c0_i32, %c0_i32_0 : i32, i32
  }
  func.func @transform_3(%arg0: i32, %arg1: i32, %arg2: i32) -> (i32, i32) {
    %c0_i32 = arith.constant 0 : i32
    %c0_i32_0 = arith.constant 0 : i32
    %c0_i32_1 = arith.constant 0 : i32
    return %c0_i32, %c0_i32_0 : i32, i32
  }
  func.func @transform_4(%arg0: i32, %arg1: i32, %arg2: i32) -> (i32, i32) {
    %c0_i32 = arith.constant 0 : i32
    %c0_i32_0 = arith.constant 0 : i32
    %c0_i32_1 = arith.constant 0 : i32
    return %c0_i32, %c0_i32_0 : i32, i32
  }
  func.func @transform_5(%arg0: i32, %arg1: i32, %arg2: i32) -> (i32, i32) {
    %c0_i32 = arith.constant 0 : i32
    %c0_i32_0 = arith.constant 0 : i32
    %c0_i32_1 = arith.constant 0 : i32
    return %c0_i32, %c0_i32_0 : i32, i32
  }
  func.func @transform_6(%arg0: i32, %arg1: i32, %arg2: i32) -> (i32, i32) {
    %c0_i32 = arith.constant 0 : i32
    %c0_i32_0 = arith.constant 0 : i32
    %c0_i32_1 = arith.constant 0 : i32
    return %c0_i32, %c0_i32_0 : i32, i32
  }
  func.func @transform_7(%arg0: i32, %arg1: i32, %arg2: i32) -> (i32, i32) {
    %c0_i32 = arith.constant 0 : i32
    %c0_i32_0 = arith.constant 0 : i32
    %c0_i32_1 = arith.constant 0 : i32
    return %c0_i32, %c0_i32_0 : i32, i32
  }
  func.func @transform_8(%arg0: i32, %arg1: i32, %arg2: i32) -> (i32, i32) {
    %c0_i32 = arith.constant 0 : i32
    %c0_i32_0 = arith.constant 0 : i32
    %c0_i32_1 = arith.constant 0 : i32
    return %c0_i32, %c0_i32_0 : i32, i32
  }
  func.func @transform_9(%arg0: i32, %arg1: i32, %arg2: i32) -> (i32, i32) {
    %c0_i32 = arith.constant 0 : i32
    %c0_i32_0 = arith.constant 0 : i32
    %c0_i32_1 = arith.constant 0 : i32
    return %c0_i32, %c0_i32_0 : i32, i32
  }
  func.func @transform_10(%arg0: i32, %arg1: i32, %arg2: i32) -> (i32, i32) {
    %c0_i32 = arith.constant 0 : i32
    %c0_i32_0 = arith.constant 0 : i32
    %c0_i32_1 = arith.constant 0 : i32
    return %c0_i32, %c0_i32_0 : i32, i32
  }
  func.func @transform_11(%arg0: i32, %arg1: i32, %arg2: i32) -> (i32, i32) {
    %c0_i32 = arith.constant 0 : i32
    %c0_i32_0 = arith.constant 0 : i32
    %c0_i32_1 = arith.constant 0 : i32
    return %c0_i32, %c0_i32_0 : i32, i32
  }
  func.func @transform_12(%arg0: i32, %arg1: i32, %arg2: i32) -> (i32, i32) {
    %c0_i32 = arith.constant 0 : i32
    %c0_i32_0 = arith.constant 0 : i32
    %c0_i32_1 = arith.constant 0 : i32
    return %c0_i32, %c0_i32_0 : i32, i32
  }
  func.func @transform_13(%arg0: i32, %arg1: i32, %arg2: i32) -> (i32, i32) {
    %c0_i32 = arith.constant 0 : i32
    %c0_i32_0 = arith.constant 0 : i32
    %c0_i32_1 = arith.constant 0 : i32
    return %c0_i32, %c0_i32_0 : i32, i32
  }
  func.func @transform_14(%arg0: i32, %arg1: i32, %arg2: i32) -> (i32, i32) {
    %c0_i32 = arith.constant 0 : i32
    %c0_i32_0 = arith.constant 0 : i32
    %c0_i32_1 = arith.constant 0 : i32
    return %c0_i32, %c0_i32_0 : i32, i32
  }
  func.func @transform_15(%arg0: i32, %arg1: i32, %arg2: i32) -> (i32, i32) {
    %c0_i32 = arith.constant 0 : i32
    %c0_i32_0 = arith.constant 0 : i32
    %c0_i32_1 = arith.constant 0 : i32
    return %c0_i32, %c0_i32_0 : i32, i32
  }
  func.func @transform_16(%arg0: i32, %arg1: i32, %arg2: i32) -> (i32, i32, i32) {
    %c0_i32 = arith.constant 0 : i32
    %c0_i32_0 = arith.constant 0 : i32
    return %arg0, %arg1, %c0_i32 : i32, i32, i32
  }
}

</mosaic_0001>

<bundles_post_ra>
// kernel: tpu_custom_call.1
= control target key start
LH: loop header
LB: loop body
LE: loop exit
PB: predicated region body
PF: predicated region fallthrough
CT: control target
= control target key end

     0   :  { %s3865_s0 = inlined_call_operand.vmem [shape: f32[2,16,32], index: 0, kind: input, shape index: {}]   ;;  %s3866_s1 = inlined_call_operand.vmem [shape: f32[2,16,32], index: 1, kind: input, shape index: {}]   ;;  %s3867_s2 = inlined_call_operand.vmem [shape: f32[32,32], index: 2, kind: input, shape index: {}]   ;;  %s3868_s3 = inlined_call_operand.vmem [shape: f32[1,32], index: 3, kind: input, shape index: {}]   ;;  %s3869_s4 = inlined_call_operand.hbm [shape: f32[32,64], index: 4, kind: input, shape index: {}]   ;;  %s3870_s5 = inlined_call_operand.vmem [shape: f32[1,64], index: 5, kind: input, shape index: {}]   ;;  %s3871_s6 = inlined_call_operand.hbm [shape: f32[32,32], index: 6, kind: input, shape index: {}]   ;;  %s3872_s7 = inlined_call_operand.vmem [shape: f32[1,32], index: 7, kind: input, shape index: {}]   ;;  %s3873_s8 = inlined_call_operand.vmem [shape: f32[1,32], index: 8, kind: input, shape index: {}]   ;;  %s3874_s9 = inlined_call_operand.vmem [shape: f32[1,32], index: 9, kind: input, shape index: {}]   ;;  %s3875_s10 = inlined_call_operand.hbm [shape: f32[32,64], index: 10, kind: input, shape index: {}]   ;;  %s3876_s11 = inlined_call_operand.vmem [shape: f32[1,64], index: 11, kind: input, shape index: {}]   ;;  %s3877_s12 = inlined_call_operand.vmem [shape: f32[64,32], index: 12, kind: input, shape index: {}]   ;;  %s3878_s13 = inlined_call_operand.vmem [shape: f32[1,32], index: 13, kind: input, shape index: {}]   ;;  %s3879_s14 = inlined_call_operand.vmem [shape: f32[1,32], index: 14, kind: input, shape index: {}]   ;;  %s3880_s15 = inlined_call_operand.vmem [shape: f32[1,32], index: 15, kind: input, shape index: {}]   ;;  %s3881_s16 = inlined_call_operand.hbm [shape: f32[2,16,32], index: 16, kind: output, shape index: {}]  }
   0x1   :  { %3896 = sst [smem:[#allocation30_spill]] %s3865_s0 }
   0x2   :  { %3897 = sst [smem:[#allocation31_spill]] %s3869_s4 }
   0x3   :  { %3898 = sst [smem:[#allocation32_spill]] %s3871_s6 }
   0x4   :  { %3899 = sst [smem:[#allocation33_spill]] %s3875_s10 }
   0x5   :  { %3900 = sst [smem:[#allocation34_spill]] %s3879_s14 }
   0x6   :  { %3901 = sst [smem:[#allocation35_spill]] %s3880_s15 }
   0x7   :  { %3902 = sst [smem:[#allocation36_spill]] %s3881_s16 }
   0x8   :  { %21 = vsyncpa [#allocation9], 0 }
   0x9   :  { %22 = vsyncpa [#allocation12], 0 }
   0xa   :  { %23 = vsyncpa [#allocation10], 0 }
   0xb   :  { %25 = vsyncpa [#allocation10 + $0x1], 0  ;;  %s3409_s21 = smov 0   ;;  %s3411_s22 = smov 0  }
   0xc   :  { %s3413_s23 = smov 0   ;;  %s3415_s24 = smov 0  }
   0xd   :  { %s3417_s25 = smov 0   ;;  %s3419_s26 = smov 0  }
   0xe   :  { %s3421_s27 = smov 0   ;;  %s3423_s28 = smov 0  }
   0xf   :  { %s3425_s29 = smov 0   ;;  %s3427_s30 = smov 0  }
  0x10 LB: > { %3903 = sst [smem:[#allocation18_spill]] %s3253_s21  ;;  %s2708_s0 = sadd.s32 4294967295, %s3289_s30   ;;  %s3289_s30 = sphi %s3427_s30, %s31_s30   ;;  %s3285_s29 = sphi %s3425_s29, %s3943_s29   ;;  %s3281_s28 = sphi %s3423_s28, %s3939_s28   ;;  %s3277_s27 = sphi %s3421_s27, %s3938_s27   ;;  %s3273_s26 = sphi %s3419_s26, %s3937_s26   ;;  %s3269_s25 = sphi %s3417_s25, %s3936_s25   ;;  %s3265_s24 = sphi %s3415_s24, %s3935_s24   ;;  %s3261_s23 = sphi %s3413_s23, %s3934_s23   ;;  %s3257_s22 = sphi %s3411_s22, %s3942_s22   ;;  %s3253_s21 = sphi %s3409_s21, %s3941_s21  }
  0x11   : > { %3904 = sst [smem:[#allocation19_spill]] %s3261_s23  ;;  %s2709_s17 = sadd.s32 4294967294, %s3289_s30  }
  0x12   : > { %3905 = sst [smem:[#allocation20_spill]] %s3277_s27  ;;  %s43_s18 = sadd.s32 1, %s3277_s27 }
  0x13   : > { %3906 = sst [smem:[#allocation21_spill]] %s3281_s28  ;;  %s46_s19 = sadd.s32 1, %s3281_s28 }
  0x14   : > { %3907 = sst [smem:[#allocation22_spill]] %s3285_s29  ;;  %p44_p0 = scmp.ge.s32.totalorder %s43_s18, 2 }
  0x15   : > { %3908 = sst [smem:[#allocation23_spill]] %s3289_s30  ;;  %s50_s20 = sadd.s32 1, %s3285_s29 }
  0x16   : > { %s413_s16 = sadd.s32 1, %s3261_s23  ;;  %p423_p1 = scmp.ne.s32.totalorder %s3261_s23, %s3257_s22 }
  0x17   : > { %s3945_s18 = smov (%p44_p0, %s43_s18), 0  ;;  %s3947_s19 = smov (!%p44_p0, %s46_s19), %s3281_s28 }
  0x18   : > { %3909 = sst [smem:[#allocation24_spill]] %s3945_s18  ;;  %p424_p2 = scmp.eq.s32.totalorder %s2708_s0, 7 }
  0x19   : > { %p429_p3 = scmp.ne.s32.totalorder %s3257_s22, %s3253_s21  ;;  %p48_p4 = scmp.ge.s32.totalorder %s3947_s19, 2 }
  0x1a   : > { %p430_p5 = scmp.eq.s32.totalorder %s2709_s17, 7  ;;  %p3472_p6 = por %p424_p2, %p423_p1 }
  0x1b   : > { %p2710_p7 = scmp.ge.s32.totalorder %s3289_s30, 1  ;;  %s3949_s19 = smov (%p48_p4, %s3947_s19), 0 }
  0x1c   : > { %s3910_s15 = scalar_select %p3472_p6, 1, 0 }
  0x1d   : > { %3912 = sst [smem:[#allocation26_spill]] %s3949_s19  ;;  %s3951_s20 = smov (!%p48_p4, %s50_s20), %s3285_s29 }
  0x1e   : > { %3911 = sst [smem:[#allocation25_spill]] %s3910_s15  ;;  %s409_s27 = ssub.s32 %s3281_s28, %s3949_s19 }
  0x1f   : > { %p3482_p8 = por %p430_p5, %p429_p3  ;;  %p52_p9 = scmp.ge.s32.totalorder %s3951_s20, 2 }
  0x20   : > { %p437_p10 = scmp.lt.s32.totalorder %s3289_s30, 9  ;;  %p3487_p11 = scmp.eq.s32.totalorder %s2708_s0, 0 }
  0x21   : > { %s3913_s14 = scalar_select %p3482_p8, 1, 0 }
  0x22   : > { %s3953_s20 = smov (%p52_p9, %s3951_s20), 0  ;;  %p3493_p12 = pnand %p2710_p7, %p437_p10 }
  0x23   : > { %3914 = sst [smem:[#allocation27_spill]] %s3913_s14  ;;  %s408_s19 = ssub.s32 %s3285_s29, %s3953_s20 }
  0x24   : > { %3916 = sst [smem:[#allocation28_spill]] %s3953_s20  ;;  %s410_s28 = sor.u32 %s409_s27, %s408_s19 }
  0x25   : > { %p2930_p13 = pneg %p3493_p12  ;;  %p411_p0 = scmp.eq.s32.totalorder %s410_s28, 0 }
  0x26   : > { %s3291_s14 = smov [#allocation11]  }
  0x27   : > { %p3503_p1 = pnand %p3487_p11, %p2930_p13  ;;  %s471_s21 = sshll.u32 %s3291_s14, 4  ;;  %s472_s21 = int_to_ptr.vmem [resolvable:$true] %s471_s21 }
  0x28   : > { %s3508_s30 = scalar_select %p411_p0, %s3261_s23, %s413_s16  }
  0x29   : > { %p3097_p2 = pneg %p3503_p1  ;;  %s3106_s15 = scalar_lea.vmem %s472_s21, 512 }
  0x2a   : > { %3919 = sst [smem:[#allocation29_spill]] %s3508_s30  ;;  %p3107_p3 = scmp.ne.s32.totalorder %s472_s21, %s3106_s15 }
  0x2b   : > { %p3114_p7 = scmp.lt.s32.totalorder %s472_s21, %s472_s21  ;;  %p3115_p9 = scmp.lt.s32.totalorder %s3106_s15, %s3106_s15 }
  0x2c   : > { %p3109_p4 = pnand %p3107_p3, %p3097_p2 }
  0x2d   : > { %p3116_p10 = por %p3115_p9, %p3114_p7 }
  0x2e   : > { %p3110_p5 = pneg %p3109_p4 }
  0x30   : > { %p3117_p13 = pnand %p3116_p10, %p3110_p5 }
  0x32   : > { %3120 = shalt.err (!%p3117_p13)
}
  0x33   : > { %s3292_s27 = smov 128   ;;  %s3293_s14 = smov 8  }
  0x34   : > { %s3920_s6 = sld [smem:[#allocation32_spill]]  ;;  %s3294_s19 = smov [#allocation8]  }
  0x35   : > { %s455_s20 = sshll.u32 %s3294_s19, 4  ;;  %s3295_s29 = smov [#allocation13]   ;;  %s456_s20 = int_to_ptr.vmem [resolvable:$true] %s455_s20 }
  0x36   : > { %s493_s30 = sshll.u32 %s3295_s29, 4  ;;  %s3132_s15 = scalar_lea.vmem %s456_s20, 512  ;;  %s494_s30 = int_to_ptr.vmem [resolvable:$true] %s493_s30 }
  0x37   : > { %p3133_p0 = scmp.ne.s32.totalorder %s456_s20, %s3132_s15  ;;  %p3140_p5 = scmp.lt.s32.totalorder %s456_s20, %s456_s20 }
  0x38   : > { %p3141_p7 = scmp.lt.s32.totalorder %s3132_s15, %s3132_s15 }
  0x39   : > { %p3135_p3 = pnand %p3133_p0, %p3097_p2 }
  0x3a   : > { %2936 = dma.hbm_to_vmem [thread:$0]  (!%p3503_p1), %s3920_s6, 512, %s472_s21, [#allocation12], %s3292_s27, %s3292_s27, %s3293_s14  }
  0x3b   : > { %p3136_p4 = pneg %p3135_p3  ;;  %p3142_p9 = por %p3141_p7, %p3140_p5 }
  0x3d   : > { %p3143_p10 = pnand %p3142_p9, %p3136_p4 }
  0x3f   : > { %3146 = shalt.err (!%p3143_p10)
}
  0x40   : > { %s3921_s4 = sld [smem:[#allocation31_spill]]  ;;  %s3158_s16 = scalar_lea.vmem %s494_s30, 512 }
  0x41   : > { %p3159_p13 = scmp.ne.s32.totalorder %s494_s30, %s3158_s16  ;;  %p3166_p8 = scmp.lt.s32.totalorder %s494_s30, %s494_s30 }
  0x42   : > { %p3167_p5 = scmp.lt.s32.totalorder %s3158_s16, %s3158_s16 }
  0x43   : > { %p3161_p0 = pnand %p3159_p13, %p3097_p2 }
  0x44   : > { %p3168_p4 = por %p3167_p5, %p3166_p8 }
  0x45   : > { %p3162_p3 = pneg %p3161_p0 }
  0x46   : > { %2933 = dma.hbm_to_vmem [thread:$0]  (!%p3503_p1), %s3921_s4, 512, %s456_s20, [#allocation9], %s3292_s27, %s3292_s27, %s3293_s14  }
  0x47   : > { %p3169_p7 = pnand %p3168_p4, %p3162_p3 }
  0x49   : > { %3172 = shalt.err (!%p3169_p7)
}
  0x4a   : > { %s3922_s10 = sld [smem:[#allocation33_spill]] }
  0x4c   : > { %550 = sbr.rel (%p3493_p12) target bundleno = 3115 (0xc2b), region = 84 }
  0x50   : > { %2939 = dma.hbm_to_vmem [thread:$0]  (!%p3503_p1), %s3922_s10, 512, %s494_s30, [#allocation12], %s3292_s27, %s3292_s27, %s3293_s14  }
  0x51   : > { %3240 = dma.done.wait (%p3487_p11), [#allocation9], 512  }
  0x52   : > { %3242 = vsyncadd (%p3487_p11), [#allocation9], 4294966784 }
  0x53   : > { %3244 = dma.done.wait (%p3487_p11), [#allocation12], 1024  }
  0x54   : > { %3246 = vsyncadd (%p3487_p11), [#allocation12], 4294966272  ;;  %s3894_s30 = sand.u32 1, %s3257_s22   ;;  %p621_p8 = scmp.lt.s32.totalorder %s3273_s26, 1 }
  0x55   : > { %s3559_s20 = sshll.u32 %s3894_s30, 3  ;;  %p623_p12 = scmp.lt.s32.totalorder %s3269_s25, 1 }
  0x56   : > { %s622_s17 = scalar_select %p621_p8, %s3273_s26, 1 }
  0x57   : > { %s624_s0 = scalar_select %p623_p12, %s3269_s25, 1 }
  0x58   : > { %s2720_s27 = sshll.u32 %s622_s17, 1  ;;  %p629_p1 = scmp.eq.s32.totalorder %s3269_s25, 0 }
  0x59   : > { %s626_s18 = sadd.s32 %s2720_s27, %s624_s0  ;;  %s3923_s29 = sld [smem:[#allocation30_spill]] }
  0x5a   : > { %s2721_s14 = sshll.u32 %s626_s18, 3  ;;  %s620_s23 = scalar_lea.vmem [#allocation14], %s3559_s20 }
  0x5b   : > { %s630_s28 = scalar_select %p629_p1, %s3265_s24, 0 }
  0x5c   : > { %p2724_p2 = scmp.ne.s32.totalorder %s3265_s24, 0 }
  0x5d   : > { %p633_p11 = scmp.lt.s32.totalorder %s630_s28, 1 }
  0x5e   : > { %644 = sbr.rel (%p2724_p2) target bundleno = 442 (0x1ba), region = 100 }
  0x5f   : > { %s3568_s16 = scalar_lea.vmem %s3923_s29, %s2721_s14  ;;  %s3955_s28 = smov (!%p633_p11, %s630_s28), 1 }
  0x60   : > { %s636_s19 = sadd.s32 %s2720_s27, %s3955_s28  ;;  %s3299_s29 = smov (!%p2724_p2), 104  }
  0x61   : > { %s2723_s4 = sshll.u32 %s636_s19, 3  ;;  %s3300_s28 = smov (!%p2724_p2), 120  }
  0x62   : > { %s3574_s10 = scalar_lea.vmem %s3866_s1, %s2723_s4  ;;  %s3301_s19 = smov (!%p2724_p2), 112  }
  0x63   : > { %vm645_vm0 = vcmask 7168   ;;  %v663_v0 = vld [vmem:[%s3867_s2 + $0x18] sm:$0xff]  ;;  %v3296_v1 = vmov -inf   ;;  %v3297_v2 = vmov 0.0   ;;  %v662_v3 = vld [vmem:[%s3867_s2 + $0x10] sm:$0xff]  ;;  %vm3298_vm1 = vmmov 0  }
  0x64   : > { %646 = vst.msk [vmem:[#allocation5] sm:$0xff] %vm645_vm0, %v3296_v1  ;;  %647 = vst.msk [vmem:[#allocation5 + $0x8] sm:$0xff] %vm645_vm0, %v3296_v1  ;;  %2813 = vmatprep.subr.mxu0 %v3297_v2  ;;  %2821 = vmatprep.mubr.msk.f32.mxu0 %vm3298_vm1, %v3297_v2  ;;  %v661_v4 = vld [vmem:[%s3867_s2 + $0x8] sm:$0xff]  ;;  %v660_v5 = vld [vmem:[%s3867_s2] sm:$0xff]  ;;  %vm671_vm2 = vcmask 261120   ;;  %vm654_vm3 = vcmask 64512   ;;  %v760_v13 = vlaneseq }
  0x65   : > { %648 = vst.msk [vmem:[#allocation5 + $0x10] sm:$0xff] %vm645_vm0, %v3296_v1  ;;  %649 = vst.msk [vmem:[#allocation5 + $0x18] sm:$0xff] %vm645_vm0, %v3296_v1  ;;  %2814 = vmatpush3.msra.mxu0 %v663_v0  ;;  %v659_v6 = vld [vmem:[%s3568_s16] sm:$0xff]  ;;  %v3302_v11 = vmov 1983009808  }
  0x66   : > { %650 = vst.msk [vmem:[#allocation6] sm:$0xff] %vm645_vm0, %v3297_v2  ;;  %651 = vst.msk [vmem:[#allocation6 + $0x8] sm:$0xff] %vm645_vm0, %v3297_v2  ;;  %2815 = vmatprep.subr.mxu0 %v3297_v2  ;;  %v2725_v7 = vld [vmem:[%s3868_s3] ss:$0 sm:$0xff]  ;;  %v758_v12 = vunpack.c.l.s4 %v3302_v11  ;;  %v3303_v14 = vmov 1934713408  }
  0x67   : > { %652 = vst.msk [vmem:[#allocation6 + $0x10] sm:$0xff] %vm645_vm0, %v3297_v2  ;;  %653 = vst.msk [vmem:[#allocation6 + $0x18] sm:$0xff] %vm645_vm0, %v3297_v2  ;;  %2816 = vmatpush3.msra.mxu0 %v662_v3  ;;  %v790_v15 = vunpack.c.l.s4 %v3303_v14  ;;  %v761_v17 = vshrl.u32 %v760_v13, 7 }
  0x68   : > { %2817 = vmatprep.subr.mxu0 %v3297_v2  ;;  %655 = vst.msk [vmem:[#allocation7] sm:$0xff] %vm654_vm3, %v3297_v2  ;;  %656 = vst.msk [vmem:[#allocation7 + $0x8] sm:$0xff] %vm654_vm3, %v3297_v2  ;;  %v759_v16 = vunpack.c.0.s8 %v758_v12 }
  0x69   : > { %2818 = vmatpush3.msra.mxu0 %v661_v4  ;;  %657 = vst.msk [vmem:[#allocation7 + $0x10] sm:$0xff] %vm654_vm3, %v3297_v2  ;;  %658 = vst.msk [vmem:[#allocation7 + $0x18] sm:$0xff] %vm654_vm3, %v3297_v2  ;;  %v791_v20 = vunpack.c.0.s8 %v790_v15 }
  0x6a   : > { %2819 = vmatprep.subr.mxu0 %v3297_v2  ;;  %v762_v21 = vsub.s32 %v759_v16, %v761_v17 }
  0x6b   : > { %2820 = vmatpush3.msra.mxu0 %v660_v5  ;;  %v794_v27 = vsub.s32 %v791_v20, %v761_v17 }
  0x6c   : > { %2822 = vmatmul.mubr.msk.f32.vlgmr.msra.gmra.mxu0 %vm671_vm2, %v659_v6 }
 0x12c   : > { %v741_v8 = vpop.f32.mrf.mxu0 }
 0x12d   : > { %v742_v9 = vadd.f32 %v2725_v7, %v741_v8 }
 0x12e   : > { %v2823_v10 = vpop.f32.mrf.mxu0 }
 0x12f   : > { %752 = vrot.lane.b32.xlu1 %v742_v9, %s3299_s29  ;;  %746 = vrot.lane.b32.xlu0 %v742_v9, %s3300_s28 }
 0x133   : > { %749 = vrot.lane.b32.xlu0 %v742_v9, %s3301_s19 }
 0x1a1   : > { %v753_v18 = vpop.permute.xlu1 %752  ;;  %v747_v19 = vpop.permute.xlu0 %746 }
 0x1a2   : > { %v771_v22 = vcombine.low %v747_v19, %v753_v18  ;;  %v772_v23 = vcombine.high %v747_v19, %v753_v18 }
 0x1a4   : > { %v779_v28 = vrot.slane %v771_v22, %v762_v21  ;;  %v786_v29 = vrot.slane %v772_v23, %v762_v21 }
 0x1a5   : > { %v750_v24 = vpop.permute.xlu0 %749 }
 0x1a6   : > { %v755_v25 = vcombine.low %v742_v9, %v750_v24  ;;  %v756_v26 = vcombine.high %v742_v9, %v750_v24 }
 0x1a8   : > { %v763_v30 = vrot.slane %v755_v25, %v762_v21  ;;  %v770_v31 = vrot.slane %v756_v26, %v762_v21 }
 0x1aa   : > { %v787_v32 = vcombine.low %v763_v30, %v779_v28  ;;  %v788_v33 = vcombine.high %v763_v30, %v779_v28  ;;  %v803_v34 = vcombine.low %v770_v31, %v786_v29  ;;  %v804_v35 = vcombine.high %v770_v31, %v786_v29 }
 0x1ac   : > { %v795_v36 = vrot.slane %v787_v32, %v794_v27  ;;  %v802_v37 = vrot.slane %v788_v33, %v794_v27  ;;  %v811_v38 = vrot.slane %v803_v34, %v794_v27  ;;  %v818_v39 = vrot.slane %v804_v35, %v794_v27 }
 0x1ae   : > { %v823_v40 = vcombine.low %v795_v36, %v802_v37  ;;  %v2727_v41 = vcombine.high %v795_v36, %v802_v37  ;;  %v839_v42 = vcombine.low %v811_v38, %v818_v39  ;;  %v2728_v43 = vcombine.high %v811_v38, %v818_v39 }
 0x1b0   : > { %v830_v44 = vrot.slane %v823_v40, %v762_v21  ;;  %v838_v45 = vrot.slane %v2727_v41, %v762_v21  ;;  %v846_v46 = vrot.slane %v839_v42, %v762_v21  ;;  %v854_v47 = vrot.slane %v2728_v43, %v762_v21 }
 0x1b2   : > { %v855_v48 = vcombine.low %v830_v44, %v838_v45  ;;  %v856_v49 = vcombine.high %v830_v44, %v838_v45  ;;  %v871_v50 = vcombine.low %v846_v46, %v854_v47  ;;  %v872_v51 = vcombine.high %v846_v46, %v854_v47 }
 0x1b4   : > { %v863_v52 = vrot.slane %v855_v48, %v794_v27  ;;  %v870_v53 = vrot.slane %v856_v49, %v794_v27  ;;  %v879_v54 = vrot.slane %v871_v50, %v794_v27  ;;  %v886_v55 = vrot.slane %v872_v51, %v794_v27 }
 0x1b6   : > { %v887_v56 = vcombine.low %v863_v52, %v879_v54  ;;  %v888_v57 = vcombine.high %v863_v52, %v879_v54  ;;  %v889_v58 = vcombine.low %v870_v53, %v886_v55  ;;  %v890_v59 = vcombine.high %v870_v53, %v886_v55 }
 0x1b8   : > { %891 = vst.msk [vmem:[#allocation2] sm:$0xff] %vm654_vm3, %v887_v56  ;;  %892 = vst.msk [vmem:[#allocation2 + $0x8] sm:$0xff] %vm654_vm3, %v888_v57 }
 0x1b9   : > { %893 = vst.msk [vmem:[#allocation2 + $0x10] sm:$0xff] %vm654_vm3, %v889_v58  ;;  %894 = vst.msk [vmem:[#allocation2 + $0x18] sm:$0xff] %vm654_vm3, %v890_v59 }
 0x1ba PF: > { %p2729_p9 = scmp.ne.s32.totalorder %s3269_s25, 0 }
 0x1bb   : > { %s3306_s4 = smov (!%p2729_p9), 104   ;;  %s3307_s6 = smov (!%p2729_p9), 120  }
 0x1bc   : > { %898 = sbr.rel (%p2729_p9) target bundleno = 907 (0x38b), region = 104  ;;  %s3308_s30 = smov (!%p2729_p9), 96  }
 0x1bd   : > { %s3309_s27 = smov (!%p2729_p9), 112  }
 0x1c1   : > { %v903_v60 = vld [vmem:[#allocation8 + $0x18] sm:$0xff]  ;;  %v3304_v61 = vmov 0.0   ;;  %v902_v62 = vld [vmem:[#allocation8 + $0x10] sm:$0xff]  ;;  %vm3305_vm4 = vmmov 0   ;;  %v901_v63 = vld [vmem:[#allocation8 + $0x8] sm:$0xff]  ;;  %vm911_vm5 = vcmask 261120   ;;  %v1000_v8 = vlaneseq }
 0x1c2   : > { %2824 = vmatprep.subr.mxu0 %v3304_v61  ;;  %2832 = vmatprep.mubr.msk.f32.mxu0 %vm3305_vm4, %v3304_v61  ;;  %v900_v0 = vld [vmem:[#allocation8] sm:$0xff]  ;;  %v3310_v6 = vmov 1983009808   ;;  %v3311_v9 = vmov 1934713408   ;;  %vm1133_vm6 = vcmask 64512  }
 0x1c3   : > { %2825 = vmatpush3.msra.mxu0 %v903_v60  ;;  %v899_v1 = vld [vmem:[%s3574_s10] sm:$0xff]  ;;  %v998_v7 = vunpack.c.l.s4 %v3310_v6  ;;  %v1030_v10 = vunpack.c.l.s4 %v3311_v9  ;;  %v1001_v12 = vshrl.u32 %v1000_v8, 7  ;;  %s2734_s10 = sshll.u32 %s3265_s24, 5 }
 0x1c4   : > { %2826 = vmatprep.subr.mxu0 %v3304_v61  ;;  %v2730_v2 = vld [vmem:[%s3870_s5] ss:$0 sm:$0xff]  ;;  %s1132_s18 = scalar_lea.vmem [#allocation3], %s2734_s10  ;;  %s1286_s14 = scalar_lea.vmem [#allocation4], %s2734_s10 }
 0x1c5   : > { %2827 = vmatpush3.msra.mxu0 %v902_v62  ;;  %v999_v11 = vunpack.c.0.s8 %v998_v7  ;;  %v1031_v15 = vunpack.c.0.s8 %v1030_v10 }
 0x1c6   : > { %2828 = vmatprep.subr.mxu0 %v3304_v61 }
 0x1c7   : > { %2829 = vmatpush3.msra.mxu0 %v901_v63  ;;  %v3607_v16 = vsub.s32 %v999_v11, %v1001_v12  ;;  %v3609_v22 = vsub.s32 %v1031_v15, %v1001_v12 }
 0x1c8   : > { %2830 = vmatprep.subr.mxu0 %v3304_v61 }
 0x1c9   : > { %2831 = vmatpush3.msra.mxu0 %v900_v0 }
 0x1ca   : > { %2833 = vmatmul.mubr.msk.f32.vlgmr.msra.gmra.mxu0 %vm911_vm5, %v899_v1 }
 0x28a   : > { %v981_v3 = vpop.f32.mrf.mxu0 }
 0x28b   : > { %v982_v4 = vadd.f32 %v2730_v2, %v981_v3 }
 0x28c   : > { %v2834_v5 = vpop.f32.mrf.mxu0 }
 0x28d   : > { %992 = vrot.lane.b32.xlu1 %v982_v4, %s3306_s4  ;;  %986 = vrot.lane.b32.xlu0 %v982_v4, %s3307_s6 }
 0x291   : > { %1138 = vrot.lane.b32.xlu1 %v982_v4, %s3308_s30  ;;  %989 = vrot.lane.b32.xlu0 %v982_v4, %s3309_s27 }
 0x2ff   : > { %v993_v13 = vpop.permute.xlu1 %992  ;;  %v987_v14 = vpop.permute.xlu0 %986 }
 0x300   : > { %1140 = vrot.lane.b32.xlu0 %v987_v14, %s3308_s30  ;;  %v1011_v17 = vcombine.low %v987_v14, %v993_v13  ;;  %v1012_v18 = vcombine.high %v987_v14, %v993_v13 }
 0x302   : > { %v1019_v23 = vrot.slane %v1011_v17, %v3607_v16  ;;  %v1026_v24 = vrot.slane %v1012_v18, %v3607_v16 }
 0x303   : > { %v990_v19 = vpop.permute.xlu0 %989  ;;  %v1139_v55 = vpop.permute.xlu1 %1138 }
 0x304   : > { %v995_v20 = vcombine.low %v982_v4, %v990_v19  ;;  %v996_v21 = vcombine.high %v982_v4, %v990_v19  ;;  %1144 = vrot.lane.b32.xlu0 %v993_v13, %s3308_s30  ;;  %1142 = vrot.lane.b32.xlu1 %v990_v19, %s3308_s30 }
 0x306   : > { %v1003_v25 = vrot.slane %v995_v20, %v3607_v16  ;;  %v1010_v26 = vrot.slane %v996_v21, %v3607_v16 }
 0x308   : > { %v1027_v27 = vcombine.low %v1003_v25, %v1019_v23  ;;  %v1028_v28 = vcombine.high %v1003_v25, %v1019_v23  ;;  %v1043_v29 = vcombine.low %v1010_v26, %v1026_v24  ;;  %v1044_v30 = vcombine.high %v1010_v26, %v1026_v24 }
 0x30a   : > { %v1035_v31 = vrot.slane %v1027_v27, %v3609_v22  ;;  %v1042_v32 = vrot.slane %v1028_v28, %v3609_v22  ;;  %v1051_v33 = vrot.slane %v1043_v29, %v3609_v22  ;;  %v1058_v34 = vrot.slane %v1044_v30, %v3609_v22 }
 0x30c   : > { %v1063_v35 = vcombine.low %v1035_v31, %v1042_v32  ;;  %v2732_v36 = vcombine.high %v1035_v31, %v1042_v32  ;;  %v1079_v37 = vcombine.low %v1051_v33, %v1058_v34  ;;  %v2733_v38 = vcombine.high %v1051_v33, %v1058_v34 }
 0x30e   : > { %v1070_v39 = vrot.slane %v1063_v35, %v3607_v16  ;;  %v1078_v40 = vrot.slane %v2732_v36, %v3607_v16  ;;  %v1086_v41 = vrot.slane %v1079_v37, %v3607_v16  ;;  %v1094_v42 = vrot.slane %v2733_v38, %v3607_v16 }
 0x310   : > { %v1095_v43 = vcombine.low %v1070_v39, %v1078_v40  ;;  %v1096_v44 = vcombine.high %v1070_v39, %v1078_v40  ;;  %v1111_v45 = vcombine.low %v1086_v41, %v1094_v42  ;;  %v1112_v46 = vcombine.high %v1086_v41, %v1094_v42 }
 0x312   : > { %v1103_v47 = vrot.slane %v1095_v43, %v3609_v22  ;;  %v1110_v48 = vrot.slane %v1096_v44, %v3609_v22  ;;  %v1119_v49 = vrot.slane %v1111_v45, %v3609_v22  ;;  %v1126_v50 = vrot.slane %v1112_v46, %v3609_v22 }
 0x314   : > { %v1127_v51 = vcombine.low %v1103_v47, %v1119_v49  ;;  %v1128_v52 = vcombine.high %v1103_v47, %v1119_v49  ;;  %v1129_v53 = vcombine.low %v1110_v48, %v1126_v50  ;;  %v1130_v54 = vcombine.high %v1110_v48, %v1126_v50 }
 0x316   : > { %1134 = vst.msk [vmem:[%s1132_s18] sm:$0xff] %vm1133_vm6, %v1127_v51  ;;  %1135 = vst.msk [vmem:[%s1132_s18 + $0x8] sm:$0xff] %vm1133_vm6, %v1128_v52 }
 0x317   : > { %1136 = vst.msk [vmem:[%s1132_s18 + $0x10] sm:$0xff] %vm1133_vm6, %v1129_v53  ;;  %1137 = vst.msk [vmem:[%s1132_s18 + $0x18] sm:$0xff] %vm1133_vm6, %v1130_v54 }
 0x372   : > { %v1141_v56 = vpop.permute.xlu0 %1140 }
 0x376   : > { %v1143_v57 = vpop.permute.xlu1 %1142  ;;  %v1145_v58 = vpop.permute.xlu0 %1144 }
 0x377   : > { %v1150_v59 = vcombine.low %v1139_v55, %v1143_v57  ;;  %v1151_v60 = vcombine.high %v1139_v55, %v1143_v57  ;;  %v1166_v61 = vcombine.low %v1141_v56, %v1145_v58  ;;  %v1167_v62 = vcombine.high %v1141_v56, %v1145_v58 }
 0x379   : > { %v1158_v63 = vrot.slane %v1150_v59, %v3607_v16  ;;  %v1165_v0 = vrot.slane %v1151_v60, %v3607_v16  ;;  %v1174_v1 = vrot.slane %v1166_v61, %v3607_v16  ;;  %v1181_v2 = vrot.slane %v1167_v62, %v3607_v16 }
 0x37b   : > { %v1182_v3 = vcombine.low %v1158_v63, %v1174_v1  ;;  %v1183_v4 = vcombine.high %v1158_v63, %v1174_v1  ;;  %v1198_v5 = vcombine.low %v1165_v0, %v1181_v2  ;;  %v1199_v6 = vcombine.high %v1165_v0, %v1181_v2 }
 0x37d   : > { %v1190_v7 = vrot.slane %v1182_v3, %v3609_v22  ;;  %v1197_v8 = vrot.slane %v1183_v4, %v3609_v22  ;;  %v1206_v9 = vrot.slane %v1198_v5, %v3609_v22  ;;  %v1213_v10 = vrot.slane %v1199_v6, %v3609_v22 }
 0x37f   : > { %v1218_v11 = vcombine.low %v1190_v7, %v1197_v8  ;;  %v2735_v12 = vcombine.high %v1190_v7, %v1197_v8  ;;  %v1234_v13 = vcombine.low %v1206_v9, %v1213_v10  ;;  %v2736_v14 = vcombine.high %v1206_v9, %v1213_v10 }
 0x381   : > { %v1225_v15 = vrot.slane %v1218_v11, %v3607_v16  ;;  %v1233_v17 = vrot.slane %v2735_v12, %v3607_v16  ;;  %v1241_v18 = vrot.slane %v1234_v13, %v3607_v16  ;;  %v1249_v19 = vrot.slane %v2736_v14, %v3607_v16 }
 0x383   : > { %v1250_v20 = vcombine.low %v1225_v15, %v1233_v17  ;;  %v1251_v21 = vcombine.high %v1225_v15, %v1233_v17  ;;  %v1266_v23 = vcombine.low %v1241_v18, %v1249_v19  ;;  %v1267_v24 = vcombine.high %v1241_v18, %v1249_v19 }
 0x385   : > { %v1258_v25 = vrot.slane %v1250_v20, %v3609_v22  ;;  %v1265_v26 = vrot.slane %v1251_v21, %v3609_v22  ;;  %v1274_v27 = vrot.slane %v1266_v23, %v3609_v22  ;;  %v1281_v28 = vrot.slane %v1267_v24, %v3609_v22 }
 0x387   : > { %v1282_v29 = vcombine.low %v1258_v25, %v1274_v27  ;;  %v1283_v30 = vcombine.high %v1258_v25, %v1274_v27  ;;  %v1284_v31 = vcombine.low %v1265_v26, %v1281_v28  ;;  %v1285_v32 = vcombine.high %v1265_v26, %v1281_v28 }
 0x389   : > { %1287 = vst.msk [vmem:[%s1286_s14] sm:$0xff] %vm1133_vm6, %v1282_v29  ;;  %1288 = vst.msk [vmem:[%s1286_s14 + $0x8] sm:$0xff] %vm1133_vm6, %v1283_v30 }
 0x38a   : > { %1289 = vst.msk [vmem:[%s1286_s14 + $0x10] sm:$0xff] %vm1133_vm6, %v1284_v31  ;;  %1290 = vst.msk [vmem:[%s1286_s14 + $0x18] sm:$0xff] %vm1133_vm6, %v1285_v32 }
 0x38b PF: > { %s2737_s15 = sshll.u32 %s3265_s24, 5  ;;  %vm1306_vm7 = vcmask 64512   ;;  %v3312_v16 = vmov 0.0   ;;  %vm3313_vm8 = vmmov 0   ;;  %v1302_v34 = vld [vmem:[#allocation2] sm:$0xff]  ;;  %v1303_v35 = vld [vmem:[#allocation2 + $0x8] sm:$0xff] }
 0x38c   : > { %2835 = vmatprep.subr.mxu0 %v3312_v16  ;;  %2840 = vmatprep.subr.mxu1 %v3312_v16  ;;  %s1292_s21 = scalar_lea.vmem [#allocation3], %s2737_s15  ;;  %v1304_v38 = vld [vmem:[#allocation2 + $0x10] sm:$0xff]  ;;  %v1305_v39 = vld [vmem:[#allocation2 + $0x18] sm:$0xff]  ;;  %v3314_v52 = vmov 0   ;;  %v1611_v53 = vld [vmem:[#allocation5] sm:$0xff]  ;;  %vm1699_vm9 = vcmask 7168  }
 0x38d   : > { %v1293_v22 = vld [vmem:[%s1292_s21] sm:$0xff]  ;;  %2837 = vmatprep.mubr.msk.f32.mxu0 %vm3313_vm8, %v3312_v16  ;;  %v1294_v33 = vld [vmem:[%s1292_s21 + $0x8] sm:$0xff]  ;;  %2842 = vmatprep.mubr.msk.f32.mxu1 %vm3313_vm8, %v3312_v16  ;;  %v1295_v36 = vld [vmem:[%s1292_s21 + $0x10] sm:$0xff]  ;;  %s3703_s29 = scalar_lea.vmem [#allocation4], %s2737_s15  ;;  %p2750_p10 = scmp.ne.s32.totalorder %s3265_s24, 1 }
 0x38e   : > { %2836 = vmatpush3.xpose.msk.msra.mxu0 %vm1306_vm7, %v1293_v22  ;;  %2841 = vmatpush3.xpose.msk.msra.mxu1 %vm1306_vm7, %v1294_v33  ;;  %v1296_v37 = vld [vmem:[%s1292_s21 + $0x18] sm:$0xff]  ;;  %v3689_v56 = vld [vmem:[#allocation5 + $0x8] sm:$0xff]  ;;  %v1613_v57 = vld [vmem:[#allocation5 + $0x10] sm:$0xff]  ;;  %s3320_s24 = smov (!%p2750_p10), 16   ;;  %s3321_s28 = smov (!%p2750_p10), 8  }
 0x38f   : > { %2845 = vmatprep.subr.mxu0 %v3312_v16  ;;  %2850 = vmatprep.subr.mxu1 %v3312_v16  ;;  %v3693_v0 = vld [vmem:[#allocation5 + $0x18] sm:$0xff]  ;;  %s3322_s19 = smov (!%p2750_p10), 24  }
 0x390   : > { %3063 = vset.pattern.permute.xlu0 %v3314_v52  ;;  %3064 = vset.pattern.permute.xlu1 %v3314_v52  ;;  %v1678_v52 = vld [vmem:[#allocation6 + $0x18] sm:$0xff] }
 0x391   : > { %2838 = vmatmul.mubr.msk.f32.vlgmr.msra.gmra.mxu0 %vm1306_vm7, %v1302_v34  ;;  %2843 = vmatmul.mubr.msk.f32.vlgmr.msra.gmra.mxu1 %vm1306_vm7, %v1303_v35  ;;  %v1298_v6 = vld [vmem:[%s3703_s29] sm:$0xff]  ;;  %v1299_v7 = vld [vmem:[%s3703_s29 + $0x8] sm:$0xff]  ;;  %v1300_v23 = vld [vmem:[%s3703_s29 + $0x10] sm:$0xff] }
 0x392   : > { %2846 = vmatpush3.xpose.msk.msra.mxu0 %vm1306_vm7, %v1295_v36  ;;  %2847 = vmatprep.mubr.msk.f32.mxu0 %vm3313_vm8, %v3312_v16  ;;  %v1301_v27 = vld [vmem:[%s3703_s29 + $0x18] sm:$0xff]  ;;  %s3924_s29 = sld [smem:[#allocation34_spill]] (!%p2750_p10) }
 0x393   : > { %2851 = vmatpush3.xpose.msk.msra.mxu1 %vm1306_vm7, %v1296_v37  ;;  %2852 = vmatprep.mubr.msk.f32.mxu1 %vm3313_vm8, %v3312_v16 }
 0x394   : > { %2855 = vmatprep.subr.mxu0 %v3312_v16  ;;  %2860 = vmatprep.subr.mxu1 %v3312_v16 }
 0x395   : > { %2848 = vmatmul.mubr.msk.f32.vlgmr.msra.gmra.mxu0 %vm1306_vm7, %v1304_v38  ;;  %v1675_v38 = vld [vmem:[#allocation6] sm:$0xff] }
 0x396   : > { %2853 = vmatmul.mubr.msk.f32.vlgmr.msra.gmra.mxu1 %vm1306_vm7, %v1305_v39  ;;  %2857 = vmatprep.mubr.msk.f32.mxu0 %vm3313_vm8, %v3312_v16 }
 0x397   : > { %2862 = vmatprep.mubr.msk.f32.mxu1 %vm3313_vm8, %v3312_v16  ;;  %2856 = vmatpush3.msra.mxu0 %v1298_v6 }
 0x398   : > { %2865 = vmatprep.subr.mxu0 %v3312_v16  ;;  %2861 = vmatpush3.msra.mxu1 %v1299_v7 }
 0x399   : > { %2870 = vmatprep.subr.mxu1 %v3312_v16 }
 0x451   : > { %v1379_v40 = vpop.f32.mrf.mxu0  ;;  %v1455_v41 = vpop.f32.mrf.mxu1 }
 0x452   : > { %v1615_v42 = vsel %vm1306_vm7, %v1379_v40, -inf  ;;  %v1618_v45 = vsel %vm1306_vm7, %v1455_v41, -inf }
 0x453   : > { %1616 = vmax.xlane.f32.xlu0 %v1615_v42  ;;  %v2839_v43 = vpop.f32.mrf.mxu0  ;;  %v2844_v44 = vpop.f32.mrf.mxu1 }
 0x455   : > { %v1531_v46 = vpop.f32.mrf.mxu0 }
 0x456   : > { %v1607_v47 = vpop.f32.mrf.mxu1  ;;  %v1621_v48 = vsel %vm1306_vm7, %v1531_v46, -inf }
 0x457   : > { %1619 = vmax.xlane.f32.xlu0 %v1618_v45  ;;  %v2849_v49 = vpop.f32.mrf.mxu0  ;;  %1622 = vmax.xlane.f32.xlu1 %v1621_v48  ;;  %v1624_v51 = vsel %vm1306_vm7, %v1607_v47, -inf  ;;  %v1704_v48 = vld [vmem:[#allocation7] sm:$0xff] }
 0x458   : > { %v2854_v50 = vpop.f32.mrf.mxu1 }
 0x45b   : > { %1625 = vmax.xlane.f32.xlu1 %v1624_v51 }
 0x4dc   : > { %v1617_v54 = vpop.xlane.xlu0 %1616 }
 0x4dd   : > { %v1627_v55 = vmax.f32 %v1611_v53, %v1617_v54 }
 0x4df   : > { %v1631_v58 = vsub.f32 %v1611_v53, %v1627_v55  ;;  %2032 = vst.msk [vmem:[#allocation5] sm:$0xff] %vm1699_vm9, %v1627_v55  ;;  %1645 = vperm.xlu0 %3063, %v1627_v55   ;;  %v1705_v53 = vld [vmem:[#allocation7 + $0x8] sm:$0xff] }
 0x4e0   : > { %v1620_v59 = vpop.xlane.xlu0 %1619  ;;  %v1623_v60 = vpop.xlane.xlu1 %1622 }
 0x4e1   : > { %v1635_v61 = vmul.f32 1.442695, %v1631_v58  ;;  %v1628_v62 = vmax.f32 %v3689_v56, %v1620_v59  ;;  %v1629_v63 = vmax.f32 %v1613_v57, %v1623_v60 }
 0x4e3   : > { %3065 = vpow2.f32 %v1635_v61  ;;  %v1632_v1 = vsub.f32 %v3689_v56, %v1628_v62  ;;  %2033 = vst.msk [vmem:[#allocation5 + $0x8] sm:$0xff] %vm1699_vm9, %v1628_v62  ;;  %1650 = vperm.xlu1 %3064, %v1628_v62   ;;  %v1633_v2 = vsub.f32 %v1613_v57, %v1629_v63  ;;  %2034 = vst.msk [vmem:[#allocation5 + $0x10] sm:$0xff] %vm1699_vm9, %v1629_v63  ;;  %v1706_v62 = vld [vmem:[#allocation7 + $0x10] sm:$0xff] }
 0x4e4   : > { %v1626_v3 = vpop.xlane.xlu1 %1625 }
 0x4e5   : > { %v1630_v4 = vmax.f32 %v3693_v0, %v1626_v3  ;;  %v1639_v25 = vmul.f32 1.442695, %v1633_v2  ;;  %v1637_v31 = vmul.f32 1.442695, %v1632_v1 }
 0x4e7   : > { %1655 = vperm.xlu1 %3064, %v1629_v63   ;;  %v1634_v5 = vsub.f32 %v3693_v0, %v1630_v4  ;;  %2035 = vst.msk [vmem:[#allocation5 + $0x18] sm:$0xff] %vm1699_vm9, %v1630_v4 }
 0x4e9   : > { %v1641_v35 = vmul.f32 1.442695, %v1634_v5 }
 0x4eb   : > { %1660 = vperm.xlu1 %3064, %v1630_v4   ;;  %v1707_v4 = vld [vmem:[#allocation7 + $0x18] sm:$0xff] }
 0x4f0   : > { %v3066_v8 = vpop.eup %3065 }
 0x4f1   : > { %1710 = vperm.xlu1 %3064, %v3066_v8   ;;  %v1679_v39 = vmul.f32 %v3066_v8, %v1675_v38 }
 0x55a   : > { %v1646_v9 = vpop.permute.xlu0 %1645 }
 0x55b   : > { %v1663_v10 = vsub.f32 %v1379_v40, %v1646_v9 }
 0x55d   : > { %v1667_v11 = vmul.f32 1.442695, %v1663_v10 }
 0x55e   : > { %v1651_v12 = vpop.permute.xlu1 %1650 }
 0x55f   : > { %3067 = vpow2.f32 %v1667_v11  ;;  %v1664_v13 = vsub.f32 %v1455_v41, %v1651_v12  ;;  %v1676_v41 = vld [vmem:[#allocation6 + $0x8] sm:$0xff] }
 0x561   : > { %v1669_v14 = vmul.f32 1.442695, %v1664_v13 }
 0x562   : > { %v1656_v15 = vpop.permute.xlu1 %1655 }
 0x563   : > { %3069 = vpow2.f32 %v1669_v14  ;;  %v1665_v17 = vsub.f32 %v1531_v46, %v1656_v15 }
 0x565   : > { %v1671_v18 = vmul.f32 1.442695, %v1665_v17 }
 0x566   : > { %v1661_v19 = vpop.permute.xlu1 %1660 }
 0x567   : > { %3071 = vpow2.f32 %v1671_v18  ;;  %v1666_v20 = vsub.f32 %v1607_v47, %v1661_v19  ;;  %v1677_v47 = vld [vmem:[#allocation6 + $0x10] sm:$0xff] }
 0x569   : > { %v1673_v21 = vmul.f32 1.442695, %v1666_v20 }
 0x56b   : > { %3073 = vpow2.f32 %v1673_v21 }
 0x56c   : > { %v3068_v24 = vpop.eup %3067  ;;  %3075 = vpow2.f32 %v1639_v25  ;;  %v1711_v37 = vpop.permute.xlu1 %1710 }
 0x56d   : > { %2858 = vmatmul.mubr.msk.f32.vlgmr.msra.gmra.mxu0 %vm1306_vm7, %v3068_v24  ;;  %v1683_v26 = vsel %vm1306_vm7, %v3068_v24, 0.0  ;;  %3077 = vpow2.f32 %v1637_v31  ;;  %v1728_v50 = vmul.f32 %v1711_v37, %v1704_v48 }
 0x56e   : > { %1684 = vadd.xlane.f32.xlu1 %v1683_v26  ;;  %2866 = vmatpush3.msra.mxu0 %v1300_v23  ;;  %3079 = vpow2.f32 %v1641_v35 }
 0x56f   : > { %2867 = vmatprep.mubr.msk.f32.mxu0 %vm3313_vm8, %v3312_v16 }
 0x570   : > { %v3070_v28 = vpop.eup %3069 }
 0x571   : > { %2863 = vmatmul.mubr.msk.f32.vlgmr.msra.gmra.mxu1 %vm1306_vm7, %v3070_v28  ;;  %v1686_v29 = vsel %vm1306_vm7, %v3070_v28, 0.0 }
 0x572   : > { %1687 = vadd.xlane.f32.xlu0 %v1686_v29  ;;  %2871 = vmatpush3.msra.mxu1 %v1301_v27 }
 0x573   : > { %2872 = vmatprep.mubr.msk.f32.mxu1 %vm3313_vm8, %v3312_v16 }
 0x574   : > { %v3072_v30 = vpop.eup %3071 }
 0x575   : > { %2868 = vmatmul.mubr.msk.f32.vlgmr.msra.gmra.mxu0 %vm1306_vm7, %v3072_v30  ;;  %v1689_v34 = vsel %vm1306_vm7, %v3072_v30, 0.0 }
 0x578   : > { %v3074_v32 = vpop.eup %3073 }
 0x579   : > { %2873 = vmatmul.mubr.msk.f32.vlgmr.msra.gmra.mxu1 %vm1306_vm7, %v3074_v32  ;;  %v3076_v22 = vpop.eup %3075  ;;  %v1692_v36 = vsel %vm1306_vm7, %v3074_v32, 0.0 }
 0x57a   : > { %v3078_v33 = vpop.eup %3077  ;;  %v1681_v49 = vmul.f32 %v3076_v22, %v1677_v47 }
 0x57b   : > { %v3080_v16 = vpop.eup %3079  ;;  %v1680_v43 = vmul.f32 %v3078_v33, %v1676_v41 }
 0x57c   : > { %v1682_v59 = vmul.f32 %v3080_v16, %v1678_v52 }
 0x57f   : > { %1720 = vperm.xlu1 %3064, %v3076_v22  }
 0x588   : > { %1715 = vperm.xlu0 %3063, %v3078_v33  }
 0x5a3   : > { %1690 = vadd.xlane.f32.xlu1 %v1689_v34 }
 0x5a7   : > { %1693 = vadd.xlane.f32.xlu1 %v1692_v36 }
 0x5b8   : > { %1725 = vperm.xlu1 %3064, %v3080_v16  }
 0x5f7   : > { %v1685_v40 = vpop.xlane.xlu1 %1684 }
 0x5f8   : > { %v1695_v42 = vadd.f32 %v1685_v40, %v1679_v39 }
 0x5fa   : > { %1700 = vst.msk [vmem:[#allocation6] sm:$0xff] %vm1699_vm9, %v1695_v42 }
 0x5fb   : > { %v1688_v44 = vpop.xlane.xlu0 %1687  ;;  %v1721_v46 = vpop.permute.xlu1 %1720 }
 0x5fc   : > { %v1696_v45 = vadd.f32 %v1688_v44, %v1680_v43  ;;  %v1730_v3 = vmul.f32 %v1721_v46, %v1706_v62 }
 0x5fe   : > { %1701 = vst.msk [vmem:[#allocation6 + $0x8] sm:$0xff] %vm1699_vm9, %v1696_v45 }
 0x603   : > { %v1716_v54 = vpop.permute.xlu0 %1715 }
 0x604   : > { %v1729_v60 = vmul.f32 %v1716_v54, %v1705_v53 }
 0x62c   : > { %v1691_v51 = vpop.xlane.xlu1 %1690 }
 0x62d   : > { %v1697_v55 = vadd.f32 %v1691_v51, %v1681_v49  ;;  %v1801_v56 = vpop.f32.mrf.mxu0 }
 0x62e   : > { %v2024_v57 = vadd.f32 %v1801_v56, %v1728_v50 }
 0x62f   : > { %1702 = vst.msk [vmem:[#allocation6 + $0x10] sm:$0xff] %vm1699_vm9, %v1697_v55  ;;  %v2859_v58 = vpop.f32.mrf.mxu0 }
 0x630   : > { %2028 = vst.msk [vmem:[#allocation7] sm:$0xff] %vm1306_vm7, %v2024_v57  ;;  %v1694_v61 = vpop.xlane.xlu1 %1693 }
 0x631   : > { %v1698_v63 = vadd.f32 %v1694_v61, %v1682_v59  ;;  %v1874_v0 = vpop.f32.mrf.mxu1 }
 0x632   : > { %v2025_v1 = vadd.f32 %v1874_v0, %v1729_v60 }
 0x633   : > { %1703 = vst.msk [vmem:[#allocation6 + $0x18] sm:$0xff] %vm1699_vm9, %v1698_v63  ;;  %v2864_v2 = vpop.f32.mrf.mxu1 }
 0x634   : > { %2029 = vst.msk [vmem:[#allocation7 + $0x8] sm:$0xff] %vm1306_vm7, %v2025_v1  ;;  %v1726_v5 = vpop.permute.xlu1 %1725 }
 0x635   : > { %v1947_v6 = vpop.f32.mrf.mxu0  ;;  %v1731_v9 = vmul.f32 %v1726_v5, %v1707_v4 }
 0x636   : > { %v2026_v7 = vadd.f32 %v1947_v6, %v1730_v3 }
 0x637   : > { %v2869_v8 = vpop.f32.mrf.mxu0 }
 0x638   : > { %2030 = vst.msk [vmem:[#allocation7 + $0x10] sm:$0xff] %vm1306_vm7, %v2026_v7  ;;  %2039 = sbr.rel (%p2750_p10) target bundleno = 3089 (0xc11), region = 108 }
 0x639   : > { %v2020_v10 = vpop.f32.mrf.mxu1 }
 0x63a   : > { %v2027_v11 = vadd.f32 %v2020_v10, %v1731_v9 }
 0x63b   : > { %v2874_v12 = vpop.f32.mrf.mxu1 }
 0x63c   : > { %2031 = vst.msk [vmem:[#allocation7 + $0x18] sm:$0xff] %vm1306_vm7, %v2027_v11 }
 0x63d   : > { %v2046_v13 = vld [vmem:[#allocation6 + $0x10] sm:$0xff]  ;;  %v2044_v14 = vld [vmem:[#allocation6] sm:$0xff]  ;;  %v2047_v15 = vld [vmem:[#allocation6 + $0x18] sm:$0xff]  ;;  %v3315_v17 = vmov 0   ;;  %v3316_v25 = vmov 0.0   ;;  %v2081_v28 = vlaneseq  ;;  %vm3319_vm10 = vmmov 0  }
 0x63e   : > { %3082 = vset.pattern.permute.xlu1 %v3315_v17  ;;  %3081 = vset.pattern.permute.xlu0 %v3315_v17  ;;  %3083 = vrcp.f32 %v2046_v13  ;;  %v2045_v18 = vld [vmem:[#allocation6 + $0x8] sm:$0xff]  ;;  %v2232_v24 = vld [vmem:[#allocation11 + $0x18] sm:$0xff]  ;;  %v3317_v26 = vmov 1983009808   ;;  %v2040_v30 = vld [vmem:[#allocation7] sm:$0xff]  ;;  %vm2225_vm11 = vcmask 130048  }
 0x63f   : > { %3085 = vrcp.f32 %v2044_v14  ;;  %2875 = vmatprep.subr.mxu1 %v3316_v25  ;;  %2897 = vmatprep.subr.mxu0 %v3316_v25  ;;  %v2079_v27 = vunpack.c.l.s4 %v3317_v26  ;;  %v2042_v29 = vld [vmem:[#allocation7 + $0x10] sm:$0xff]  ;;  %v3318_v22 = vmov 1934713408   ;;  %v2082_v36 = vshrl.u32 %v2081_v28, 7  ;;  %v2041_v38 = vld [vmem:[#allocation7 + $0x8] sm:$0xff]  ;;  %v2229_v4 = vld [vmem:[#allocation11] sm:$0xff] }
 0x640   : > { %3087 = vrcp.f32 %v2047_v15  ;;  %2876 = vmatpush3.msra.mxu1 %v2232_v24  ;;  %v2111_v33 = vunpack.c.l.s4 %v3318_v22  ;;  %v2231_v58 = vld [vmem:[#allocation11 + $0x10] sm:$0xff]  ;;  %v2230_v63 = vld [vmem:[#allocation11 + $0x8] sm:$0xff]  ;;  %2883 = vmatprep.mubr.msk.f32.mxu1 %vm3319_vm10, %v3316_v25  ;;  %vm2227_vm12 = vcmask 195584   ;;  %vm2240_vm13 = vcmask 261120  }
 0x641   : > { %3089 = vrcp.f32 %v2045_v18  ;;  %2877 = vmatprep.subr.mxu1 %v3316_v25  ;;  %v2080_v35 = vunpack.c.0.s8 %v2079_v27  ;;  %2913 = vmatprep.mubr.msk.f32.mxu0 %vm3319_vm10, %v3316_v25  ;;  %vm2446_vm14 = vcmask 523264  }
 0x642   : > { %v2112_v41 = vunpack.c.0.s8 %v2111_v33  ;;  %2878 = vmatpush3.msra.mxu1 %v2231_v58  ;;  %v2433_v58 = vld [vmem:[%s3877_s12 + $0x10] sm:$0xff] }
 0x643   : > { %v2043_v37 = vld [vmem:[#allocation7 + $0x18] sm:$0xff]  ;;  %v2083_v43 = vsub.s32 %v2080_v35, %v2082_v36  ;;  %2879 = vmatprep.subr.mxu1 %v3316_v25 }
 0x644   : > { %v2115_v49 = vsub.s32 %v2112_v41, %v2082_v36  ;;  %2880 = vmatpush3.msra.mxu1 %v2230_v63  ;;  %v2348_v41 = vld [vmem:[#allocation13 + $0x10] sm:$0xff] }
 0x645   : > { %2881 = vmatprep.subr.mxu1 %v3316_v25 }
 0x646   : > { %2882 = vmatpush3.msra.mxu1 %v2229_v4 }
 0x647   : > { %2886 = vmatprep.subr.mxu1 %v3316_v25 }
 0x64b   : > { %v3084_v19 = vpop.eup %3083 }
 0x64c   : > { %v3086_v20 = vpop.eup %3085  ;;  %2064 = vperm.xlu1 %3082, %v3084_v19  }
 0x64d   : > { %v3088_v21 = vpop.eup %3087  ;;  %2054 = vperm.xlu0 %3081, %v3086_v20  }
 0x64e   : > { %v3090_v23 = vpop.eup %3089 }
 0x650   : > { %2069 = vperm.xlu1 %3082, %v3088_v21  }
 0x651   : > { %2059 = vperm.xlu0 %3081, %v3090_v23  }
 0x6c7   : > { %v2065_v31 = vpop.permute.xlu1 %2064 }
 0x6c8   : > { %v2055_v32 = vpop.permute.xlu0 %2054  ;;  %v2074_v34 = vmul.f32 %v2065_v31, %v2042_v29 }
 0x6c9   : > { %v2072_v16 = vmul.f32 %v2055_v32, %v2040_v30  ;;  %v2753_v30 = vld [vmem:[%s3872_s7] ss:$0 sm:$0xff] }
 0x6ca   : > { %v2314_v32 = vld [vmem:[%s3568_s16] sm:$0xff] }
 0x6cb   : > { %v2070_v39 = vpop.permute.xlu1 %2069  ;;  %v2076_v44 = vcombine.low %v2072_v16, %v2074_v34  ;;  %v2077_v45 = vcombine.high %v2072_v16, %v2074_v34 }
 0x6cc   : > { %v2075_v40 = vmul.f32 %v2070_v39, %v2043_v37  ;;  %v2060_v42 = vpop.permute.xlu0 %2059 }
 0x6cd   : > { %v2073_v46 = vmul.f32 %v2060_v42, %v2041_v38  ;;  %v2084_v50 = vrot.slane %v2076_v44, %v2083_v43  ;;  %v2091_v51 = vrot.slane %v2077_v45, %v2083_v43  ;;  %v2347_v42 = vld [vmem:[#allocation13 + $0x8] sm:$0xff]  ;;  %v2438_v44 = vld [vmem:[%s3877_s12 + $0x38] sm:$0xff]  ;;  %v2437_v45 = vld [vmem:[%s3877_s12 + $0x30] sm:$0xff] }
 0x6ce   : > { %2898 = vmatpush3.msra.mxu0 %v2438_v44 }
 0x6cf   : > { %v2092_v47 = vcombine.low %v2073_v46, %v2075_v40  ;;  %v2093_v48 = vcombine.high %v2073_v46, %v2075_v40  ;;  %v2349_v40 = vld [vmem:[#allocation13 + $0x18] sm:$0xff]  ;;  %2899 = vmatprep.subr.mxu0 %v3316_v25  ;;  %v2436_v46 = vld [vmem:[%s3877_s12 + $0x28] sm:$0xff] }
 0x6d0   : > { %2900 = vmatpush3.msra.mxu0 %v2437_v45 }
 0x6d1   : > { %v2100_v52 = vrot.slane %v2092_v47, %v2083_v43  ;;  %v2107_v53 = vrot.slane %v2093_v48, %v2083_v43  ;;  %2901 = vmatprep.subr.mxu0 %v3316_v25  ;;  %v2435_v47 = vld [vmem:[%s3877_s12 + $0x20] sm:$0xff]  ;;  %v2434_v48 = vld [vmem:[%s3877_s12 + $0x18] sm:$0xff] }
 0x6d2   : > { %2902 = vmatpush3.msra.mxu0 %v2436_v46 }
 0x6d3   : > { %v2108_v54 = vcombine.low %v2084_v50, %v2100_v52  ;;  %v2109_v55 = vcombine.high %v2084_v50, %v2100_v52  ;;  %v2124_v56 = vcombine.low %v2091_v51, %v2107_v53  ;;  %v2125_v57 = vcombine.high %v2091_v51, %v2107_v53  ;;  %2903 = vmatprep.subr.mxu0 %v3316_v25  ;;  %v2755_v53 = vld [vmem:[%s3873_s8] ss:$0 sm:$0xff] }
 0x6d4   : > { %2904 = vmatpush3.msra.mxu0 %v2435_v47 }
 0x6d5   : > { %v2116_v59 = vrot.slane %v2108_v54, %v2115_v49  ;;  %v2123_v60 = vrot.slane %v2109_v55, %v2115_v49  ;;  %v2132_v61 = vrot.slane %v2124_v56, %v2115_v49  ;;  %v2139_v62 = vrot.slane %v2125_v57, %v2115_v49  ;;  %2905 = vmatprep.subr.mxu0 %v3316_v25  ;;  %v2756_v55 = vld [vmem:[%s3874_s9] ss:$0 sm:$0xff] }
 0x6d6   : > { %2906 = vmatpush3.msra.mxu0 %v2434_v48 }
 0x6d7   : > { %v2144_v0 = vcombine.low %v2116_v59, %v2123_v60  ;;  %v2751_v1 = vcombine.high %v2116_v59, %v2123_v60  ;;  %v2160_v2 = vcombine.low %v2132_v61, %v2139_v62  ;;  %v2752_v3 = vcombine.high %v2132_v61, %v2139_v62  ;;  %2907 = vmatprep.subr.mxu0 %v3316_v25  ;;  %v2432_v59 = vld [vmem:[%s3877_s12 + $0x8] sm:$0xff]  ;;  %v2431_v60 = vld [vmem:[%s3877_s12] sm:$0xff] }
 0x6d8   : > { %2908 = vmatpush3.msra.mxu0 %v2433_v58  ;;  %v2757_v61 = vld [vmem:[%s3876_s11] ss:$0 sm:$0xff] }
 0x6d9   : > { %v2151_v5 = vrot.slane %v2144_v0, %v2083_v43  ;;  %v2159_v6 = vrot.slane %v2751_v1, %v2083_v43  ;;  %v2167_v7 = vrot.slane %v2160_v2, %v2083_v43  ;;  %v2175_v8 = vrot.slane %v2752_v3, %v2083_v43  ;;  %v2346_v43 = vld [vmem:[#allocation13] sm:$0xff]  ;;  %2909 = vmatprep.subr.mxu0 %v3316_v25 }
 0x6da   : > { %2910 = vmatpush3.msra.mxu0 %v2432_v59  ;;  %v2759_v2 = vld [vmem:[%s3878_s13] ss:$0 sm:$0xff] }
 0x6db   : > { %v2177_v9 = vcombine.high %v2151_v5, %v2159_v6  ;;  %v2193_v10 = vcombine.high %v2167_v7, %v2175_v8  ;;  %v2176_v11 = vcombine.low %v2151_v5, %v2159_v6  ;;  %v2192_v12 = vcombine.low %v2167_v7, %v2175_v8  ;;  %2911 = vmatprep.subr.mxu0 %v3316_v25 }
 0x6dc   : > { %2912 = vmatpush3.msra.mxu0 %v2431_v60 }
 0x6dd   : > { %v2191_v13 = vrot.slane %v2177_v9, %v2115_v49  ;;  %v2207_v14 = vrot.slane %v2193_v10, %v2115_v49  ;;  %v2184_v15 = vrot.slane %v2176_v11, %v2115_v49  ;;  %v2200_v17 = vrot.slane %v2192_v12, %v2115_v49 }
 0x6df   : > { %v2210_v18 = vcombine.low %v2191_v13, %v2207_v14  ;;  %v2209_v19 = vcombine.high %v2184_v15, %v2200_v17  ;;  %v2208_v20 = vcombine.low %v2184_v15, %v2200_v17  ;;  %v2211_v21 = vcombine.high %v2191_v13, %v2207_v14  ;;  %v2761_v17 = vld [vmem:[%s3924_s29] ss:$0 sm:$0xff] }
 0x6e1   : > { %2217 = vrot.lane.b32.xlu1 %v2210_v18, %s3320_s24  ;;  %2213 = vrot.lane.b32.xlu0 %v2209_v19, %s3321_s28 }
 0x6e5   : > { %2221 = vrot.lane.b32.xlu0 %v2211_v21, %s3322_s19  ;;  %s3925_s19 = sld [smem:[#allocation35_spill]] }
 0x6eb   : > { %v2762_v19 = vld [vmem:[%s3925_s19] ss:$0 sm:$0xff] }
 0x753   : > { %v2214_v23 = vpop.permute.xlu0 %2213  ;;  %v2218_v24 = vpop.permute.xlu1 %2217 }
 0x754   : > { %v2224_v26 = vsel %vm1306_vm7, %v2208_v20, %v2214_v23 }
 0x755   : > { %v2226_v27 = vsel %vm2225_vm11, %v2224_v26, %v2218_v24 }
 0x757   : > { %v2222_v28 = vpop.permute.xlu0 %2221 }
 0x758   : > { %v2228_v29 = vsel %vm2227_vm12, %v2226_v27, %v2222_v28 }
 0x759   : > { %2884 = vmatmul.mubr.msk.f32.vlgmr.msra.gmra.mxu1 %vm2240_vm13, %v2228_v29 }
 0x75a   : > { %2894 = vmatprep.mubr.msk.f32.mxu1 %vm3319_vm10, %v3316_v25  ;;  %2887 = vmatpush3.msra.mxu1 %v2349_v40 }
 0x75b   : > { %2888 = vmatprep.subr.mxu1 %v3316_v25 }
 0x75c   : > { %2889 = vmatpush3.msra.mxu1 %v2348_v41 }
 0x75d   : > { %2890 = vmatprep.subr.mxu1 %v3316_v25 }
 0x75e   : > { %2891 = vmatpush3.msra.mxu1 %v2347_v42 }
 0x75f   : > { %2892 = vmatprep.subr.mxu1 %v3316_v25 }
 0x760   : > { %2893 = vmatpush3.msra.mxu1 %v2346_v43 }
 0x819   : > { %v2310_v31 = vpop.f32.mrf.mxu1 }
 0x81a   : > { %v2311_v22 = vadd.f32 %v2753_v30, %v2310_v31 }
 0x81b   : > { %v2885_v33 = vpop.f32.mrf.mxu1 }
 0x81c   : > { %v2315_v34 = vadd.f32 %v2314_v32, %v2311_v22 }
 0x81e   : > { %v2318_v35 = vsel %vm2240_vm13, %v2315_v34, 0.0 }
 0x81f   : > { %2319 = vadd.xlane.f32.xlu1 %v2318_v35 }
 0x8a8   : > { %v2320_v36 = vpop.xlane.xlu1 %2319 }
 0x8a9   : > { %v2322_v16 = vmul.f32 0.03125, %v2320_v36 }
 0x8ab   : > { %v2323_v37 = vsub.f32 %v2315_v34, %v2322_v16 }
 0x8ad   : > { %v2324_v38 = vmul.f32 %v2323_v37, %v2323_v37 }
 0x8af   : > { %v2325_v39 = vsel %vm2240_vm13, %v2324_v38, 0.0 }
 0x8b0   : > { %2326 = vadd.xlane.f32.xlu0 %v2325_v39 }
 0x939   : > { %v2327_v49 = vpop.xlane.xlu0 %2326 }
 0x93a   : > { %v2328_v50 = vmul.f32 0.03125, %v2327_v49 }
 0x93c   : > { %v2329_v51 = vadd.f32 1e-05, %v2328_v50 }
 0x93e   : > { %3091 = vrsqrt.f32 %v2329_v51 }
 0x94b   : > { %v3092_v52 = vpop.eup %3091 }
 0x94c   : > { %v2331_v54 = vmul.f32 %v3092_v52, %v2323_v37 }
 0x94e   : > { %v2338_v56 = vmul.f32 %v2755_v53, %v2331_v54 }
 0x950   : > { %v2345_v57 = vadd.f32 %v2756_v55, %v2338_v56 }
 0x952   : > { %2895 = vmatmul.mubr.msk.f32.vlgmr.msra.gmra.mxu1 %vm2240_vm13, %v2345_v57 }
 0xa12   : > { %v2426_v62 = vpop.f32.mrf.mxu1 }
 0xa13   : > { %v2427_v63 = vadd.f32 %v2757_v61, %v2426_v62 }
 0xa14   : > { %v2896_v0 = vpop.f32.mrf.mxu1 }
 0xa15   : > { %v2430_v1 = vmax.f32 %v2427_v63, 0.0 }
 0xa17   : > { %2914 = vmatmul.mubr.msk.f32.vlgmr.msra.gmra.mxu0 %vm2446_vm14, %v2430_v1 }
 0xad7   : > { %v2516_v25 = vpop.f32.mrf.mxu0 }
 0xad8   : > { %v2517_v3 = vadd.f32 %v2759_v2, %v2516_v25 }
 0xad9   : > { %v2915_v4 = vpop.f32.mrf.mxu0 }
 0xada   : > { %v2520_v5 = vadd.f32 %v2517_v3, %v2345_v57 }
 0xadc   : > { %v2523_v6 = vsel %vm2240_vm13, %v2520_v5, 0.0 }
 0xadd   : > { %2524 = vadd.xlane.f32.xlu0 %v2523_v6 }
 0xb66   : > { %v2525_v7 = vpop.xlane.xlu0 %2524 }
 0xb67   : > { %v2526_v8 = vmul.f32 0.03125, %v2525_v7 }
 0xb69   : > { %v2527_v9 = vsub.f32 %v2520_v5, %v2526_v8 }
 0xb6b   : > { %v2528_v10 = vmul.f32 %v2527_v9, %v2527_v9 }
 0xb6d   : > { %v2529_v11 = vsel %vm2240_vm13, %v2528_v10, 0.0 }
 0xb6e   : > { %2530 = vadd.xlane.f32.xlu1 %v2529_v11 }
 0xbf7   : > { %v2531_v12 = vpop.xlane.xlu1 %2530 }
 0xbf8   : > { %v2532_v13 = vmul.f32 0.03125, %v2531_v12 }
 0xbfa   : > { %v2533_v14 = vadd.f32 1e-05, %v2532_v13 }
 0xbfc   : > { %3093 = vrsqrt.f32 %v2533_v14 }
 0xc09   : > { %v3094_v15 = vpop.eup %3093 }
 0xc0a   : > { %v2535_v18 = vmul.f32 %v3094_v15, %v2527_v9 }
 0xc0c   : > { %v2542_v20 = vmul.f32 %v2761_v17, %v2535_v18 }
 0xc0e   : > { %v2549_v21 = vadd.f32 %v2762_v19, %v2542_v20 }
 0xc10   : > { %2550 = vst.msk [vmem:[%s620_s23] sm:$0xff] %vm2240_vm13, %v2549_v21 }
 0xc11 PF: > { %s2764_s0 = sshll.u32 %s3273_s26, 1  ;;  %s2567_s4 = sshll.u32 %s620_s23, 4  ;;  %s2568_s4 = int_to_ptr.vmem [resolvable:$true] %s2567_s4 }
 0xc12   : > { %s2563_s16 = sadd.s32 %s3269_s25, %s2764_s0  ;;  %s3927_s10 = sld [smem:[#allocation36_spill]] }
 0xc13   : > { %s2765_s6 = sshll.u32 %s2563_s16, 7  ;;  %s3928_s14 = sand.u32 1, %s3257_s22  }
 0xc14   : > { %s2552_s15 = scalar_lea.sflag [#allocation10], %s3928_s14  ;;  %s3173_s21 = scalar_lea.vmem %s2568_s4, 128 }
 0xc15   : > { %p3174_p13 = scmp.ne.s32.totalorder %s2568_s4, %s3173_s21  ;;  %s3323_s29 = smov [#allocation14]  }
 0xc16   : > { %s3177_s24 = sshll.u32 %s3323_s29, 4  ;;  %s3178_s24 = int_to_ptr.vmem [resolvable:$false] %s3177_s24 }
 0xc17   : > { %p3175_p0 = pnand %p3174_p13, %p3472_p6  ;;  %s3179_s26 = scalar_lea.vmem %s3178_s24, 256 }
 0xc18   : > { %s2565_s18 = scalar_lea.hbm %s3927_s10, %s2765_s6  ;;  %p3180_p5 = scmp.lt.s32.totalorder %s2568_s4, %s3178_s24 }
 0xc19   : > { %p3176_p3 = pneg %p3175_p0  ;;  %p3181_p4 = scmp.lt.s32.totalorder %s3179_s26, %s3173_s21 }
 0xc1b   : > { %p3182_p7 = por %p3181_p4, %p3180_p5 }
 0xc1d   : > { %p3183_p8 = pnand %p3182_p7, %p3176_p3 }
 0xc1f   : > { %3186 = shalt.err (!%p3183_p8)
}
 0xc20   : > { %s3187_s23 = scalar_lea.hbm %s2565_s18, 128  ;;  %s3191_s28 = scalar_lea.hbm %s3927_s10, 512 }
 0xc21   : > { %p3188_p12 = scmp.ne.s32.totalorder %s2565_s18, %s3187_s23  ;;  %p3192_p2 = scmp.lt.s32.totalorder %s2565_s18, %s3927_s10 }
 0xc22   : > { %p3193_p9 = scmp.lt.s32.totalorder %s3191_s28, %s3187_s23 }
 0xc23   : > { %p3189_p1 = pnand %p3188_p12, %p3472_p6 }
 0xc24   : > { %p3194_p10 = por %p3193_p9, %p3192_p2 }
 0xc25   : > { %p3190_p11 = pneg %p3189_p1 }
 0xc27   : > { %p3195_p13 = pnand %p3194_p10, %p3190_p11 }
 0xc29   : > { %3198 = shalt.err (!%p3195_p13)
}
 0xc2a   : > { %2928 = dma.vmem_to_hbm [thread:$0]  (%p3472_p6), %s2568_s4, 128, %s2565_s18, %s2552_s15  }
 0xc2b PF: > { %s3929_s16 = sld [smem:[#allocation23_spill]] }
 0xc2c   : > { %s3930_s6 = sld [smem:[#allocation18_spill]] }
 0xc2d   : > { %s3931_s30 = sld [smem:[#allocation27_spill]] }
 0xc31   : > { %p2950_p0 = scmp.ge.s32.totalorder %s3929_s16, 2 }
 0xc32   : > { %s2579_s27 = sand.u32 1, %s3930_s6  }
 0xc33   : > { %p3932_p3 = scmp.ne.s32.totalorder %s3931_s30, 0  ;;  %s2580_s14 = scalar_lea.sflag [#allocation10], %s2579_s27 }
 0xc35   : > { %p2941_p5 = pnand %p2950_p0, %p3932_p3 }
 0xc37   : > { %p2942_p4 = pneg %p2941_p5 }
 0xc39   : > { %3248 = dma.done.wait (%p2942_p4), %s2580_s14, 128  }
 0xc3a   : > { %3250 = vsyncadd (%p2942_p4), %s2580_s14, 4294967168  ;;  %s31_s30 = sadd.s32 1, %s3929_s16   ;;  %s3933_s29 = sld [smem:[#allocation19_spill]] }
 0xc3b   : > { %p28_p7 = scmp.ge.s32.totalorder %s31_s30, 10   ;;  %s3934_s23 = sld [smem:[#allocation29_spill]] }
 0xc3c   : > { %s3935_s24 = sld [smem:[#allocation20_spill]]  ;;  %s3941_s21 = smov %s3257_s22 }
 0xc3d   : > { %s3936_s25 = sld [smem:[#allocation21_spill]] }
 0xc3e   : > { %s3937_s26 = sld [smem:[#allocation22_spill]] }
 0xc3f   : > { %s3938_s27 = sld [smem:[#allocation24_spill]] }
 0xc40   : > { %s3939_s28 = sld [smem:[#allocation26_spill]]  ;;  %s3942_s22 = smov %s3933_s29 }
 0xc41   : > { %s3940_s17 = sld [smem:[#allocation28_spill]] }
 0xc43   :  { %30 = sbr.rel (!%p28_p7) target bundleno = 16 (0x10), region = 151 }
 0xc47   : > { %s3943_s29 = smov %s3940_s17 }
 0xc48   :  { %2585 = vsyncpa [#allocation9], 1 }
 0xc49   :  { %2587 = vsyncpa [#allocation9 + $0x1], 1 }
 0xc4a   :  { %2588 = vsyncpa [#allocation12], 1 }
 0xc4b   :  { %2589 = vsyncpa [#allocation10], 1 }
 0xc4c   :  { %2591 = vsyncpa [#allocation10 + $0x1], 1 }

</bundles_post_ra>
